<compile_context>
chip_gen: v5e
topology: v5e:2x2
jax: 0.10.0
libtpu: 0.0.40
codegen_flags: <defaults>
</compile_context>

<pallas_src>
import functools
import math

import jax
import jax.numpy as jnp
from jax.experimental import pallas as pl
from jax.experimental.pallas import tpu as pltpu


def encoder_stack_kernel(num_heads, head_dim,
                         x_ref, mask_ref, kpm_ref,
                         wqkv_ref, wo_ref, w1_ref, w2_ref, vecs_ref,
                         out_ref, attn_scratch):
    """One grid step = (batch block bb, layer l).

    The residual stream of the whole batch block is carried across the layer
    axis in the resident output block (same out-block index for every l), so
    activations never round-trip through HBM between layers and each layer's
    weights are DMA'd once per batch block.
    """
    l = pl.program_id(1)

    # Seed the residual-stream carry with the input at the first layer.
    @pl.when(l == 0)
    def _():
        out_ref[...] = x_ref[...]

    x3 = out_ref[...]                                  # (Bb, S, E) f32
    Bb, S, E = x3.shape
    F = w1_ref.shape[-1]
    H, d = num_heads, head_dim
    x2 = x3.reshape(Bb * S, E)                         # leading-dim merge: free

    # Packed per-layer vectors: rows of the (8, Dmax) slab.
    bqkv = vecs_ref[0:1, 0:3 * E]
    bo   = vecs_ref[1:2, 0:E]
    g1   = vecs_ref[2:3, 0:E]
    be1  = vecs_ref[3:4, 0:E]
    b1   = vecs_ref[4:5, 0:F]
    b2   = vecs_ref[5:6, 0:E]
    g2   = vecs_ref[6:7, 0:E]
    be2  = vecs_ref[7:8, 0:E]

    # ---- QKV projection over the whole batch block: MXU M = Bb*S ----------
    qkv = jnp.dot(x2.astype(jnp.bfloat16), wqkv_ref[...],
                  preferred_element_type=jnp.float32) + bqkv    # (Bb*S, 3E)
    qkv3 = qkv.reshape(Bb, S, 3 * E)                            # free reshape

    # Additive attention bias: shared float attn_mask (S,S) + per-element
    # key-padding row (Bb,1,S), broadcast over query rows (same for all heads).
    bias = mask_ref[...] + kpm_ref[...]                         # (Bb, S, S)

    # ---- multi-head self-attention (1/sqrt(d) already folded into W_q) ----
    # Per-head loop, but every dot is batched over the batch block (3-D
    # dot_general with a leading batch dim).  Head outputs are written
    # straight into the VMEM slab -> no concatenate tree.
    for h in range(H):
        lo = h * d
        qh = qkv3[:, :, lo:lo + d].astype(jnp.bfloat16)              # (Bb,S,d)
        kh = qkv3[:, :, E + lo:E + lo + d].astype(jnp.bfloat16)      # (Bb,S,d)
        vh = qkv3[:, :, 2 * E + lo:2 * E + lo + d].astype(jnp.bfloat16)
        s = jax.lax.dot_general(qh, kh, (((2,), (2,)), ((0,), (0,))),
                                preferred_element_type=jnp.float32)  # (Bb,S,S)
        s = s + bias
        s = s - jnp.max(s, axis=-1, keepdims=True)
        p = jnp.exp(s)                                               # f32
        inv = pl.reciprocal(jnp.sum(p, axis=-1, keepdims=True), approx=True)
        o = jax.lax.dot_general(p.astype(jnp.bfloat16), vh,
                                (((2,), (1,)), ((0,), (0,))),
                                preferred_element_type=jnp.float32)  # (Bb,S,d)
        o = o * inv                     # normalize after PV: S*d muls, not S*S
        attn_scratch[:, lo:lo + d] = o.reshape(Bb * S, d)

    attn = jnp.dot(attn_scratch[...].astype(jnp.bfloat16), wo_ref[...],
                   preferred_element_type=jnp.float32) + bo          # (Bb*S,E)

    def layernorm(y, g, b):             # f32 statistics throughout
        mu = jnp.mean(y, axis=-1, keepdims=True)
        var = jnp.mean((y - mu) ** 2, axis=-1, keepdims=True)
        return (y - mu) * jax.lax.rsqrt(var + 1e-5) * g + b

    x1 = layernorm(x2 + attn, g1, be1)

    # ---- feed-forward (M = Bb*S) ------------------------------------------
    h1 = jnp.dot(x1.astype(jnp.bfloat16), w1_ref[...],
                 preferred_element_type=jnp.float32) + b1
    h1 = jnp.maximum(h1, 0.0)
    ff = jnp.dot(h1.astype(jnp.bfloat16), w2_ref[...],
                 preferred_element_type=jnp.float32) + b2

    # Single full-tile store of the new residual stream (carry + final output).
    out_ref[...] = layernorm(x1 + ff, g2, be2).reshape(Bb, S, E)


def _prepare_stacked_params(layer_params, num_heads):
    """Stack per-layer params along a leading layer axis, fold the 1/sqrt(d)
    attention scale into the Q projection, cast matmul weights to bf16, and
    pack the eight per-layer vectors into one (L, 8, Dmax) f32 slab."""
    stacked = [jnp.stack([jnp.asarray(p[i], jnp.float32) for p in layer_params])
               for i in range(12)]
    wqkv, bqkv, wo, bo, g1, be1, w1, b1, w2, b2, g2, be2 = stacked
    L, E, _ = wqkv.shape
    F = w1.shape[-1]
    head_dim = E // num_heads
    scale = 1.0 / math.sqrt(head_dim)
    qscale = jnp.concatenate([jnp.full((E,), scale, jnp.float32),
                              jnp.ones((2 * E,), jnp.float32)])
    wqkv = wqkv * qscale[None, None, :]     # free at runtime
    bqkv = bqkv * qscale[None, :]

    d_max = max(3 * E, F)

    def row(v):                              # (L, D) -> (L, 1, Dmax) f32
        D = v.shape[-1]
        return jnp.pad(v, ((0, 0), (0, d_max - D)))[:, None, :]

    vecs = jnp.concatenate([row(bqkv), row(bo), row(g1), row(be1),
                            row(b1), row(b2), row(g2), row(be2)],
                           axis=1).astype(jnp.float32)            # (L, 8, Dmax)

    return (wqkv.astype(jnp.bfloat16), wo.astype(jnp.bfloat16),
            w1.astype(jnp.bfloat16), w2.astype(jnp.bfloat16), vecs)


def transformer_encoder_custom2(x, layer_params, num_heads,
                                attn_mask=None, key_padding_mask=None,
                                batch_block=None):
    """Stack of identical-architecture encoder layers (distinct weights)."""
    x = jnp.asarray(x, jnp.float32)
    B, S, E = x.shape
    L = len(layer_params)
    head_dim = E // num_heads
    wqkv, wo, w1, w2, vecs = _prepare_stacked_params(layer_params, num_heads)
    F = w1.shape[-1]
    d_max = vecs.shape[-1]

    # Generation-aware VMEM budget: v7x has only 64 MiB/TC, v5e/v6e 128 MiB.
    try:
        vmem_cap = int(pltpu.get_tpu_info().vmem_capacity_bytes)
    except Exception:
        vmem_cap = 64 * 1024 * 1024
    vmem_limit = min(100 * 1024 * 1024, (vmem_cap * 3) // 4)

    # Per-layer weight bytes (bf16 matrices + f32 vector slab).
    layer_w_bytes = 2 * (3 * E * E + E * E + 2 * E * F) + 4 * 8 * d_max
    # Single-buffer the FFN weights if double-buffering the full weight set
    # would eat more than half the VMEM budget (mainly a v7x concern).
    ffn_mode = pl.Buffered(1) if 2 * layer_w_bytes > vmem_limit // 2 else None

    # How many batch elements share one weight fetch: as many as the
    # activation working set allows (amortizes weight HBM traffic ~B_blk x and
    # raises MXU M from S to B_blk*S).
    if batch_block is None:
        act_bytes_per_elem = 4 * S * (6 * E + F + 4 * S)
        act_budget = max(vmem_limit // 4, act_bytes_per_elem)
        batch_block = max(1, min(B, act_budget // act_bytes_per_elem))
        while B % batch_block:
            batch_block -= 1
    nb = B // batch_block

    # Additive float (S, S) attention mask (boolean mask -> -1e9 where True).
    if attn_mask is None:
        mask = jnp.zeros((S, S), jnp.float32)
    elif attn_mask.dtype == jnp.bool_:
        mask = jnp.where(attn_mask, -1e9, 0.0).astype(jnp.float32)
    else:
        mask = attn_mask.astype(jnp.float32)

    # Key-padding bias kept at (B, 1, S); broadcast over query rows in-kernel
    # instead of shipping a (B, S, S) bias through HBM.
    if key_padding_mask is None:
        kpm = jnp.zeros((B, 1, S), jnp.float32)
    else:
        kpm = jnp.where(key_padding_mask, -1e9, 0.0).astype(jnp.float32)
        kpm = kpm.reshape(B, 1, S)

    def wspec(shape, mode=None):
        nd = len(shape)
        idx = lambda bb, l: (l,) + (0,) * nd
        if mode is None:
            return pl.BlockSpec((None,) + tuple(shape), idx)
        return pl.BlockSpec((None,) + tuple(shape), idx, pipeline_mode=mode)

    kernel = functools.partial(encoder_stack_kernel, num_heads, head_dim)

    flops = B * L * (8 * S * E * E + 4 * S * S * E + 4 * S * E * F)
    transcendentals = B * L * num_heads * S * S
    bytes_accessed = (nb * L * layer_w_bytes + 2 * B * S * E * 4
                      + nb * L * (S * S + batch_block * S) * 4)
    cost = pl.CostEstimate(flops=int(flops),
                           transcendentals=int(transcendentals),
                           bytes_accessed=int(bytes_accessed))

    return pl.pallas_call(
        kernel,
        out_shape=jax.ShapeDtypeStruct((B, S, E), jnp.float32),
        grid=(nb, L),                     # batch blocks outer (parallel), layers inner
        in_specs=[
            pl.BlockSpec((batch_block, S, E), lambda bb, l: (bb, 0, 0)),   # x
            pl.BlockSpec((S, S), lambda bb, l: (0, 0)),                    # attn_mask
            pl.BlockSpec((batch_block, 1, S), lambda bb, l: (bb, 0, 0)),   # key-pad bias
            wspec((E, 3 * E)),                                             # in_proj W
            wspec((E, E)),                                                 # out_proj W
            wspec((E, F), ffn_mode),                                       # linear1 W
            wspec((F, E), ffn_mode),                                       # linear2 W
            wspec((8, d_max)),                                             # packed vectors
        ],
        out_specs=pl.BlockSpec((batch_block, S, E), lambda bb, l: (bb, 0, 0)),
        scratch_shapes=[pltpu.VMEM((batch_block * S, E), jnp.float32)],
        compiler_params=pltpu.CompilerParams(
            dimension_semantics=("parallel", "arbitrary"),
            vmem_limit_bytes=int(vmem_limit)),
        cost_estimate=cost,
    )(x, mask, kpm, wqkv, wo, w1, w2, vecs)


def init_layer_params(key, E, F):
    ks = jax.random.split(key, 4)
    wqkv = 0.02 * jax.random.normal(ks[0], (E, 3 * E), jnp.float32)
    bqkv = jnp.zeros((3 * E,), jnp.float32)
    wo = 0.02 * jax.random.normal(ks[1], (E, E), jnp.float32)
    bo = jnp.zeros((E,), jnp.float32)
    g1 = jnp.ones((E,), jnp.float32)
    be1 = jnp.zeros((E,), jnp.float32)
    w1 = 0.02 * jax.random.normal(ks[2], (E, F), jnp.float32)
    b1 = jnp.zeros((F,), jnp.float32)
    w2 = 0.02 * jax.random.normal(ks[3], (F, E), jnp.float32)
    b2 = jnp.zeros((E,), jnp.float32)
    g2 = jnp.ones((E,), jnp.float32)
    be2 = jnp.zeros((E,), jnp.float32)
    return (wqkv, bqkv, wo, bo, g1, be1, w1, b1, w2, b2, g2, be2)


if __name__ == "__main__":
    B, S, E, H, F = 2, 8, 32, 4, 64
    num_layers = 2

    key = jax.random.PRNGKey(0)
    kx, kmask, *kl = jax.random.split(key, 2 + num_layers)

    x = jax.random.normal(kx, (B, S, E), jnp.float32)
    attn_mask = 0.1 * jax.random.normal(kmask, (S, S), jnp.float32)
    # pad the last position of batch element 1
    key_padding_mask = jnp.zeros((B, S), jnp.bool_).at[1, -1].set(True)

    layer_params = [init_layer_params(k, E, F) for k in kl]

    out = transformer_encoder_custom2(x, layer_params, H,
                                      attn_mask=attn_mask,
                                      key_padding_mask=key_padding_mask)
    jax.block_until_ready(out)
    assert out.shape == (B, S, E)
    assert bool(jnp.all(jnp.isfinite(out)))
    print("KERNEL_OK")
</pallas_src>

<mosaic_0001>
module attributes {stable_mosaic.version = 11 : i64} {
  func.func @encoder_stack_kernel(%arg0: i32, %arg1: i32, %arg2: memref<2x8x32xf32, #tpu.memory_space<vmem>>, %arg3: memref<8x8xf32, #tpu.memory_space<vmem>>, %arg4: memref<2x1x8xf32, #tpu.memory_space<vmem>>, %arg5: memref<1x32x96xbf16, #tpu.memory_space<vmem>>, %arg6: memref<1x32x32xbf16, #tpu.memory_space<vmem>>, %arg7: memref<1x32x64xbf16, #tpu.memory_space<vmem>>, %arg8: memref<1x64x32xbf16, #tpu.memory_space<vmem>>, %arg9: memref<1x8x96xf32, #tpu.memory_space<vmem>>, %arg10: memref<2x8x32xf32, #tpu.memory_space<vmem>>, %arg11: memref<16x32xf32, #tpu.memory_space<vmem>>) attributes {dimension_semantics = [#tpu.dimension_semantics<parallel>, #tpu.dimension_semantics<arbitrary>], iteration_bounds = array<i64: 1, 2>, scalar_prefetch = 0 : i64, scratch_operands = 1 : i64, tpu.core_type = #tpu.core_type<tc>, window_params = [{transform_indices = @transform_0, window_bounds = array<i64: 2, 8, 32>}, {pipeline_mode = #tpu.pipeline_mode<synchronous>, transform_indices = @transform_1, window_bounds = array<i64: 8, 8>}, {transform_indices = @transform_2, window_bounds = array<i64: 2, 1, 8>}, {transform_indices = @transform_3, window_bounds = array<i64: 1, 32, 96>}, {transform_indices = @transform_4, window_bounds = array<i64: 1, 32, 32>}, {transform_indices = @transform_5, window_bounds = array<i64: 1, 32, 64>}, {transform_indices = @transform_6, window_bounds = array<i64: 1, 64, 32>}, {transform_indices = @transform_7, window_bounds = array<i64: 1, 8, 96>}, {transform_indices = @transform_8, window_bounds = array<i64: 2, 8, 32>}]} {
    %c0_i32 = arith.constant 0 : i32
    %0 = arith.cmpi eq, %arg1, %c0_i32 : i32
    %1 = arith.extui %0 : i1 to i32
    %c0_i32_0 = arith.constant 0 : i32
    %2 = arith.cmpi ne, %1, %c0_i32_0 : i32
    scf.if %2 {
      %c0_77 = arith.constant 0 : index
      %c0_78 = arith.constant 0 : index
      %c0_79 = arith.constant 0 : index
      %191 = vector.load %arg2[%c0_77, %c0_78, %c0_79] : memref<2x8x32xf32, #tpu.memory_space<vmem>>, vector<2x8x32xf32>
      %c0_80 = arith.constant 0 : index
      %c0_81 = arith.constant 0 : index
      %c0_82 = arith.constant 0 : index
      %192 = vector.load %arg10[%c0_80, %c0_81, %c0_82] : memref<2x8x32xf32, #tpu.memory_space<vmem>>, vector<2x8x32xf32>
      tpu.vector_store %arg10[%c0_80, %c0_81, %c0_82], %191 {strides = array<i32>} : memref<2x8x32xf32, #tpu.memory_space<vmem>>, vector<2x8x32xf32>,
    } else {
    }
    %c0 = arith.constant 0 : index
    %c0_1 = arith.constant 0 : index
    %c0_2 = arith.constant 0 : index
    %3 = vector.load %arg10[%c0, %c0_1, %c0_2] : memref<2x8x32xf32, #tpu.memory_space<vmem>>, vector<2x8x32xf32>
    %4 = vector.shape_cast %3 : vector<2x8x32xf32> to vector<16x32xf32>
    %c0_3 = arith.constant 0 : index
    %c0_4 = arith.constant 0 : index
    %c0_5 = arith.constant 0 : index
    %5 = vector.load %arg9[%c0_3, %c0_4, %c0_5] : memref<1x8x96xf32, #tpu.memory_space<vmem>>, vector<1x1x96xf32>
    %6 = vector.shape_cast %5 : vector<1x1x96xf32> to vector<1x96xf32>
    %c0_6 = arith.constant 0 : index
    %c1 = arith.constant 1 : index
    %c0_7 = arith.constant 0 : index
    %7 = vector.load %arg9[%c0_6, %c1, %c0_7] : memref<1x8x96xf32, #tpu.memory_space<vmem>>, vector<1x1x32xf32>
    %8 = vector.shape_cast %7 : vector<1x1x32xf32> to vector<1x32xf32>
    %c0_8 = arith.constant 0 : index
    %c2 = arith.constant 2 : index
    %c0_9 = arith.constant 0 : index
    %9 = vector.load %arg9[%c0_8, %c2, %c0_9] : memref<1x8x96xf32, #tpu.memory_space<vmem>>, vector<1x1x32xf32>
    %10 = vector.shape_cast %9 : vector<1x1x32xf32> to vector<1x32xf32>
    %c0_10 = arith.constant 0 : index
    %c3 = arith.constant 3 : index
    %c0_11 = arith.constant 0 : index
    %11 = vector.load %arg9[%c0_10, %c3, %c0_11] : memref<1x8x96xf32, #tpu.memory_space<vmem>>, vector<1x1x32xf32>
    %12 = vector.shape_cast %11 : vector<1x1x32xf32> to vector<1x32xf32>
    %c0_12 = arith.constant 0 : index
    %c4 = arith.constant 4 : index
    %c0_13 = arith.constant 0 : index
    %13 = vector.load %arg9[%c0_12, %c4, %c0_13] : memref<1x8x96xf32, #tpu.memory_space<vmem>>, vector<1x1x64xf32>
    %14 = vector.shape_cast %13 : vector<1x1x64xf32> to vector<1x64xf32>
    %c0_14 = arith.constant 0 : index
    %c5 = arith.constant 5 : index
    %c0_15 = arith.constant 0 : index
    %15 = vector.load %arg9[%c0_14, %c5, %c0_15] : memref<1x8x96xf32, #tpu.memory_space<vmem>>, vector<1x1x32xf32>
    %16 = vector.shape_cast %15 : vector<1x1x32xf32> to vector<1x32xf32>
    %c0_16 = arith.constant 0 : index
    %c6 = arith.constant 6 : index
    %c0_17 = arith.constant 0 : index
    %17 = vector.load %arg9[%c0_16, %c6, %c0_17] : memref<1x8x96xf32, #tpu.memory_space<vmem>>, vector<1x1x32xf32>
    %18 = vector.shape_cast %17 : vector<1x1x32xf32> to vector<1x32xf32>
    %c0_18 = arith.constant 0 : index
    %c7 = arith.constant 7 : index
    %c0_19 = arith.constant 0 : index
    %19 = vector.load %arg9[%c0_18, %c7, %c0_19] : memref<1x8x96xf32, #tpu.memory_space<vmem>>, vector<1x1x32xf32>
    %20 = vector.shape_cast %19 : vector<1x1x32xf32> to vector<1x32xf32>
    %21 = arith.truncf %4 : vector<16x32xf32> to vector<16x32xbf16>
    %c0_20 = arith.constant 0 : index
    %c0_21 = arith.constant 0 : index
    %c0_22 = arith.constant 0 : index
    %22 = vector.load %arg5[%c0_20, %c0_21, %c0_22] : memref<1x32x96xbf16, #tpu.memory_space<vmem>>, vector<1x32x96xbf16>
    %23 = vector.shape_cast %22 : vector<1x32x96xbf16> to vector<32x96xbf16>
    %cst = arith.constant dense<0.000000e+00> : vector<16x96xf32>
    %24 = tpu.matmul %21, %23, %cst {dimension_numbers = #tpu.dot_dimension_numbers<[1], [0], [0], [1], [0, 0, 1, 1], [], []>} : vector<16x32xbf16>, vector<32x96xbf16>, vector<16x96xf32> -> vector<16x96xf32>
    %25 = vector.broadcast %6 : vector<1x96xf32> to vector<16x96xf32>
    %26 = arith.addf %24, %25 : vector<16x96xf32>
    %27 = vector.shape_cast %26 : vector<16x96xf32> to vector<2x8x96xf32>
    %c0_23 = arith.constant 0 : index
    %c0_24 = arith.constant 0 : index
    %28 = vector.load %arg3[%c0_23, %c0_24] : memref<8x8xf32, #tpu.memory_space<vmem>>, vector<8x8xf32>
    %c0_25 = arith.constant 0 : index
    %c0_26 = arith.constant 0 : index
    %c0_27 = arith.constant 0 : index
    %29 = vector.load %arg4[%c0_25, %c0_26, %c0_27] : memref<2x1x8xf32, #tpu.memory_space<vmem>>, vector<2x1x8xf32>
    %30 = vector.shape_cast %28 : vector<8x8xf32> to vector<1x8x8xf32>
    %31 = vector.broadcast %30 : vector<1x8x8xf32> to vector<2x8x8xf32>
    %32 = vector.broadcast %29 : vector<2x1x8xf32> to vector<2x8x8xf32>
    %33 = arith.addf %31, %32 : vector<2x8x8xf32>
    %34 = vector.extract_strided_slice %27 {offsets = [0, 0, 0], sizes = [2, 8, 8], strides = [1, 1, 1]} : vector<2x8x96xf32> to vector<2x8x8xf32>
    %35 = arith.truncf %34 : vector<2x8x8xf32> to vector<2x8x8xbf16>
    %36 = vector.extract_strided_slice %27 {offsets = [0, 0, 32], sizes = [2, 8, 8], strides = [1, 1, 1]} : vector<2x8x96xf32> to vector<2x8x8xf32>
    %37 = arith.truncf %36 : vector<2x8x8xf32> to vector<2x8x8xbf16>
    %38 = vector.extract_strided_slice %27 {offsets = [0, 0, 64], sizes = [2, 8, 8], strides = [1, 1, 1]} : vector<2x8x96xf32> to vector<2x8x8xf32>
    %39 = arith.truncf %38 : vector<2x8x8xf32> to vector<2x8x8xbf16>
    %cst_28 = arith.constant dense<0.000000e+00> : vector<2x8x8xf32>
    %40 = tpu.matmul %35, %37, %cst_28 {dimension_numbers = #tpu.dot_dimension_numbers<[2], [2], [1], [1], [0, 0, 0, 1, 1, 1], [0], [0]>} : vector<2x8x8xbf16>, vector<2x8x8xbf16>, vector<2x8x8xf32> -> vector<2x8x8xf32>
    %41 = arith.addf %40, %33 : vector<2x8x8xf32>
    %cst_29 = arith.constant dense<0xFF800000> : vector<2x8xf32>
    %42 = vector.multi_reduction <maximumf>, %41, %cst_29 [2] : vector<2x8x8xf32> to vector<2x8xf32>
    %43 = vector.shape_cast %42 : vector<2x8xf32> to vector<2x8x1xf32>
    %44 = vector.broadcast %43 : vector<2x8x1xf32> to vector<2x8x8xf32>
    %45 = arith.subf %41, %44 : vector<2x8x8xf32>
    %46 = math.exp %45 : vector<2x8x8xf32>
    %cst_30 = arith.constant dense<0.000000e+00> : vector<2x8xf32>
    %47 = vector.multi_reduction <add>, %46, %cst_30 [2] : vector<2x8x8xf32> to vector<2x8xf32>
    %48 = vector.shape_cast %47 : vector<2x8xf32> to vector<2x8x1xf32>
    %49 = tpu.reciprocal %48 {approx = true} : vector<2x8x1xf32> -> vector<2x8x1xf32>
    %50 = arith.truncf %46 : vector<2x8x8xf32> to vector<2x8x8xbf16>
    %cst_31 = arith.constant dense<0.000000e+00> : vector<2x8x8xf32>
    %51 = tpu.matmul %50, %39, %cst_31 {dimension_numbers = #tpu.dot_dimension_numbers<[2], [1], [1], [2], [0, 0, 0, 1, 1, 2], [0], [0]>} : vector<2x8x8xbf16>, vector<2x8x8xbf16>, vector<2x8x8xf32> -> vector<2x8x8xf32>
    %52 = vector.broadcast %49 : vector<2x8x1xf32> to vector<2x8x8xf32>
    %53 = arith.mulf %51, %52 : vector<2x8x8xf32>
    %54 = vector.shape_cast %53 : vector<2x8x8xf32> to vector<16x8xf32>
    %c0_32 = arith.constant 0 : index
    %c0_33 = arith.constant 0 : index
    %55 = vector.load %arg11[%c0_32, %c0_33] : memref<16x32xf32, #tpu.memory_space<vmem>>, vector<16x8xf32>
    tpu.vector_store %arg11[%c0_32, %c0_33], %54 {strides = array<i32>} : memref<16x32xf32, #tpu.memory_space<vmem>>, vector<16x8xf32>,
    %56 = vector.extract_strided_slice %27 {offsets = [0, 0, 8], sizes = [2, 8, 8], strides = [1, 1, 1]} : vector<2x8x96xf32> to vector<2x8x8xf32>
    %57 = arith.truncf %56 : vector<2x8x8xf32> to vector<2x8x8xbf16>
    %58 = vector.extract_strided_slice %27 {offsets = [0, 0, 40], sizes = [2, 8, 8], strides = [1, 1, 1]} : vector<2x8x96xf32> to vector<2x8x8xf32>
    %59 = arith.truncf %58 : vector<2x8x8xf32> to vector<2x8x8xbf16>
    %60 = vector.extract_strided_slice %27 {offsets = [0, 0, 72], sizes = [2, 8, 8], strides = [1, 1, 1]} : vector<2x8x96xf32> to vector<2x8x8xf32>
    %61 = arith.truncf %60 : vector<2x8x8xf32> to vector<2x8x8xbf16>
    %cst_34 = arith.constant dense<0.000000e+00> : vector<2x8x8xf32>
    %62 = tpu.matmul %57, %59, %cst_34 {dimension_numbers = #tpu.dot_dimension_numbers<[2], [2], [1], [1], [0, 0, 0, 1, 1, 1], [0], [0]>} : vector<2x8x8xbf16>, vector<2x8x8xbf16>, vector<2x8x8xf32> -> vector<2x8x8xf32>
    %63 = arith.addf %62, %33 : vector<2x8x8xf32>
    %cst_35 = arith.constant dense<0xFF800000> : vector<2x8xf32>
    %64 = vector.multi_reduction <maximumf>, %63, %cst_35 [2] : vector<2x8x8xf32> to vector<2x8xf32>
    %65 = vector.shape_cast %64 : vector<2x8xf32> to vector<2x8x1xf32>
    %66 = vector.broadcast %65 : vector<2x8x1xf32> to vector<2x8x8xf32>
    %67 = arith.subf %63, %66 : vector<2x8x8xf32>
    %68 = math.exp %67 : vector<2x8x8xf32>
    %cst_36 = arith.constant dense<0.000000e+00> : vector<2x8xf32>
    %69 = vector.multi_reduction <add>, %68, %cst_36 [2] : vector<2x8x8xf32> to vector<2x8xf32>
    %70 = vector.shape_cast %69 : vector<2x8xf32> to vector<2x8x1xf32>
    %71 = tpu.reciprocal %70 {approx = true} : vector<2x8x1xf32> -> vector<2x8x1xf32>
    %72 = arith.truncf %68 : vector<2x8x8xf32> to vector<2x8x8xbf16>
    %cst_37 = arith.constant dense<0.000000e+00> : vector<2x8x8xf32>
    %73 = tpu.matmul %72, %61, %cst_37 {dimension_numbers = #tpu.dot_dimension_numbers<[2], [1], [1], [2], [0, 0, 0, 1, 1, 2], [0], [0]>} : vector<2x8x8xbf16>, vector<2x8x8xbf16>, vector<2x8x8xf32> -> vector<2x8x8xf32>
    %74 = vector.broadcast %71 : vector<2x8x1xf32> to vector<2x8x8xf32>
    %75 = arith.mulf %73, %74 : vector<2x8x8xf32>
    %76 = vector.shape_cast %75 : vector<2x8x8xf32> to vector<16x8xf32>
    %c0_38 = arith.constant 0 : index
    %c8 = arith.constant 8 : index
    %77 = vector.load %arg11[%c0_38, %c8] : memref<16x32xf32, #tpu.memory_space<vmem>>, vector<16x8xf32>
    tpu.vector_store %arg11[%c0_38, %c8], %76 {strides = array<i32>} : memref<16x32xf32, #tpu.memory_space<vmem>>, vector<16x8xf32>,
    %78 = vector.extract_strided_slice %27 {offsets = [0, 0, 16], sizes = [2, 8, 8], strides = [1, 1, 1]} : vector<2x8x96xf32> to vector<2x8x8xf32>
    %79 = arith.truncf %78 : vector<2x8x8xf32> to vector<2x8x8xbf16>
    %80 = vector.extract_strided_slice %27 {offsets = [0, 0, 48], sizes = [2, 8, 8], strides = [1, 1, 1]} : vector<2x8x96xf32> to vector<2x8x8xf32>
    %81 = arith.truncf %80 : vector<2x8x8xf32> to vector<2x8x8xbf16>
    %82 = vector.extract_strided_slice %27 {offsets = [0, 0, 80], sizes = [2, 8, 8], strides = [1, 1, 1]} : vector<2x8x96xf32> to vector<2x8x8xf32>
    %83 = arith.truncf %82 : vector<2x8x8xf32> to vector<2x8x8xbf16>
    %cst_39 = arith.constant dense<0.000000e+00> : vector<2x8x8xf32>
    %84 = tpu.matmul %79, %81, %cst_39 {dimension_numbers = #tpu.dot_dimension_numbers<[2], [2], [1], [1], [0, 0, 0, 1, 1, 1], [0], [0]>} : vector<2x8x8xbf16>, vector<2x8x8xbf16>, vector<2x8x8xf32> -> vector<2x8x8xf32>
    %85 = arith.addf %84, %33 : vector<2x8x8xf32>
    %cst_40 = arith.constant dense<0xFF800000> : vector<2x8xf32>
    %86 = vector.multi_reduction <maximumf>, %85, %cst_40 [2] : vector<2x8x8xf32> to vector<2x8xf32>
    %87 = vector.shape_cast %86 : vector<2x8xf32> to vector<2x8x1xf32>
    %88 = vector.broadcast %87 : vector<2x8x1xf32> to vector<2x8x8xf32>
    %89 = arith.subf %85, %88 : vector<2x8x8xf32>
    %90 = math.exp %89 : vector<2x8x8xf32>
    %cst_41 = arith.constant dense<0.000000e+00> : vector<2x8xf32>
    %91 = vector.multi_reduction <add>, %90, %cst_41 [2] : vector<2x8x8xf32> to vector<2x8xf32>
    %92 = vector.shape_cast %91 : vector<2x8xf32> to vector<2x8x1xf32>
    %93 = tpu.reciprocal %92 {approx = true} : vector<2x8x1xf32> -> vector<2x8x1xf32>
    %94 = arith.truncf %90 : vector<2x8x8xf32> to vector<2x8x8xbf16>
    %cst_42 = arith.constant dense<0.000000e+00> : vector<2x8x8xf32>
    %95 = tpu.matmul %94, %83, %cst_42 {dimension_numbers = #tpu.dot_dimension_numbers<[2], [1], [1], [2], [0, 0, 0, 1, 1, 2], [0], [0]>} : vector<2x8x8xbf16>, vector<2x8x8xbf16>, vector<2x8x8xf32> -> vector<2x8x8xf32>
    %96 = vector.broadcast %93 : vector<2x8x1xf32> to vector<2x8x8xf32>
    %97 = arith.mulf %95, %96 : vector<2x8x8xf32>
    %98 = vector.shape_cast %97 : vector<2x8x8xf32> to vector<16x8xf32>
    %c0_43 = arith.constant 0 : index
    %c16 = arith.constant 16 : index
    %99 = vector.load %arg11[%c0_43, %c16] : memref<16x32xf32, #tpu.memory_space<vmem>>, vector<16x8xf32>
    tpu.vector_store %arg11[%c0_43, %c16], %98 {strides = array<i32>} : memref<16x32xf32, #tpu.memory_space<vmem>>, vector<16x8xf32>,
    %100 = vector.extract_strided_slice %27 {offsets = [0, 0, 24], sizes = [2, 8, 8], strides = [1, 1, 1]} : vector<2x8x96xf32> to vector<2x8x8xf32>
    %101 = arith.truncf %100 : vector<2x8x8xf32> to vector<2x8x8xbf16>
    %102 = vector.extract_strided_slice %27 {offsets = [0, 0, 56], sizes = [2, 8, 8], strides = [1, 1, 1]} : vector<2x8x96xf32> to vector<2x8x8xf32>
    %103 = arith.truncf %102 : vector<2x8x8xf32> to vector<2x8x8xbf16>
    %104 = vector.extract_strided_slice %27 {offsets = [0, 0, 88], sizes = [2, 8, 8], strides = [1, 1, 1]} : vector<2x8x96xf32> to vector<2x8x8xf32>
    %105 = arith.truncf %104 : vector<2x8x8xf32> to vector<2x8x8xbf16>
    %cst_44 = arith.constant dense<0.000000e+00> : vector<2x8x8xf32>
    %106 = tpu.matmul %101, %103, %cst_44 {dimension_numbers = #tpu.dot_dimension_numbers<[2], [2], [1], [1], [0, 0, 0, 1, 1, 1], [0], [0]>} : vector<2x8x8xbf16>, vector<2x8x8xbf16>, vector<2x8x8xf32> -> vector<2x8x8xf32>
    %107 = arith.addf %106, %33 : vector<2x8x8xf32>
    %cst_45 = arith.constant dense<0xFF800000> : vector<2x8xf32>
    %108 = vector.multi_reduction <maximumf>, %107, %cst_45 [2] : vector<2x8x8xf32> to vector<2x8xf32>
    %109 = vector.shape_cast %108 : vector<2x8xf32> to vector<2x8x1xf32>
    %110 = vector.broadcast %109 : vector<2x8x1xf32> to vector<2x8x8xf32>
    %111 = arith.subf %107, %110 : vector<2x8x8xf32>
    %112 = math.exp %111 : vector<2x8x8xf32>
    %cst_46 = arith.constant dense<0.000000e+00> : vector<2x8xf32>
    %113 = vector.multi_reduction <add>, %112, %cst_46 [2] : vector<2x8x8xf32> to vector<2x8xf32>
    %114 = vector.shape_cast %113 : vector<2x8xf32> to vector<2x8x1xf32>
    %115 = tpu.reciprocal %114 {approx = true} : vector<2x8x1xf32> -> vector<2x8x1xf32>
    %116 = arith.truncf %112 : vector<2x8x8xf32> to vector<2x8x8xbf16>
    %cst_47 = arith.constant dense<0.000000e+00> : vector<2x8x8xf32>
    %117 = tpu.matmul %116, %105, %cst_47 {dimension_numbers = #tpu.dot_dimension_numbers<[2], [1], [1], [2], [0, 0, 0, 1, 1, 2], [0], [0]>} : vector<2x8x8xbf16>, vector<2x8x8xbf16>, vector<2x8x8xf32> -> vector<2x8x8xf32>
    %118 = vector.broadcast %115 : vector<2x8x1xf32> to vector<2x8x8xf32>
    %119 = arith.mulf %117, %118 : vector<2x8x8xf32>
    %120 = vector.shape_cast %119 : vector<2x8x8xf32> to vector<16x8xf32>
    %c0_48 = arith.constant 0 : index
    %c24 = arith.constant 24 : index
    %121 = vector.load %arg11[%c0_48, %c24] : memref<16x32xf32, #tpu.memory_space<vmem>>, vector<16x8xf32>
    tpu.vector_store %arg11[%c0_48, %c24], %120 {strides = array<i32>} : memref<16x32xf32, #tpu.memory_space<vmem>>, vector<16x8xf32>,
    %c0_49 = arith.constant 0 : index
    %c0_50 = arith.constant 0 : index
    %122 = vector.load %arg11[%c0_49, %c0_50] : memref<16x32xf32, #tpu.memory_space<vmem>>, vector<16x32xf32>
    %123 = arith.truncf %122 : vector<16x32xf32> to vector<16x32xbf16>
    %c0_51 = arith.constant 0 : index
    %c0_52 = arith.constant 0 : index
    %c0_53 = arith.constant 0 : index
    %124 = vector.load %arg6[%c0_51, %c0_52, %c0_53] : memref<1x32x32xbf16, #tpu.memory_space<vmem>>, vector<1x32x32xbf16>
    %125 = vector.shape_cast %124 : vector<1x32x32xbf16> to vector<32x32xbf16>
    %cst_54 = arith.constant dense<0.000000e+00> : vector<16x32xf32>
    %126 = tpu.matmul %123, %125, %cst_54 {dimension_numbers = #tpu.dot_dimension_numbers<[1], [0], [0], [1], [0, 0, 1, 1], [], []>} : vector<16x32xbf16>, vector<32x32xbf16>, vector<16x32xf32> -> vector<16x32xf32>
    %127 = vector.broadcast %8 : vector<1x32xf32> to vector<16x32xf32>
    %128 = arith.addf %126, %127 : vector<16x32xf32>
    %129 = arith.addf %4, %128 : vector<16x32xf32>
    %cst_55 = arith.constant dense<0.000000e+00> : vector<16xf32>
    %130 = vector.multi_reduction <add>, %129, %cst_55 [1] : vector<16x32xf32> to vector<16xf32>
    %131 = vector.shape_cast %130 : vector<16xf32> to vector<16x1xf32>
    %cst_56 = arith.constant 3.200000e+01 : f32
    %132 = vector.broadcast %cst_56 : f32 to vector<16x1xf32>
    %133 = arith.divf %131, %132 : vector<16x1xf32>
    %134 = vector.broadcast %133 : vector<16x1xf32> to vector<16x32xf32>
    %135 = arith.subf %129, %134 : vector<16x32xf32>
    %136 = arith.mulf %135, %135 : vector<16x32xf32>
    %cst_57 = arith.constant dense<0.000000e+00> : vector<16xf32>
    %137 = vector.multi_reduction <add>, %136, %cst_57 [1] : vector<16x32xf32> to vector<16xf32>
    %138 = vector.shape_cast %137 : vector<16xf32> to vector<16x1xf32>
    %cst_58 = arith.constant 3.200000e+01 : f32
    %139 = vector.broadcast %cst_58 : f32 to vector<16x1xf32>
    %140 = arith.divf %138, %139 : vector<16x1xf32>
    %141 = vector.broadcast %133 : vector<16x1xf32> to vector<16x32xf32>
    %142 = arith.subf %129, %141 : vector<16x32xf32>
    %cst_59 = arith.constant 9.99999974E-6 : f32
    %143 = vector.broadcast %cst_59 : f32 to vector<16x1xf32>
    %144 = arith.addf %140, %143 : vector<16x1xf32>
    %145 = math.rsqrt %144 : vector<16x1xf32>
    %146 = vector.broadcast %145 : vector<16x1xf32> to vector<16x32xf32>
    %147 = arith.mulf %142, %146 : vector<16x32xf32>
    %148 = vector.broadcast %10 : vector<1x32xf32> to vector<16x32xf32>
    %149 = arith.mulf %147, %148 : vector<16x32xf32>
    %150 = vector.broadcast %12 : vector<1x32xf32> to vector<16x32xf32>
    %151 = arith.addf %149, %150 : vector<16x32xf32>
    %152 = arith.truncf %151 : vector<16x32xf32> to vector<16x32xbf16>
    %c0_60 = arith.constant 0 : index
    %c0_61 = arith.constant 0 : index
    %c0_62 = arith.constant 0 : index
    %153 = vector.load %arg7[%c0_60, %c0_61, %c0_62] : memref<1x32x64xbf16, #tpu.memory_space<vmem>>, vector<1x32x64xbf16>
    %154 = vector.shape_cast %153 : vector<1x32x64xbf16> to vector<32x64xbf16>
    %cst_63 = arith.constant dense<0.000000e+00> : vector<16x64xf32>
    %155 = tpu.matmul %152, %154, %cst_63 {dimension_numbers = #tpu.dot_dimension_numbers<[1], [0], [0], [1], [0, 0, 1, 1], [], []>} : vector<16x32xbf16>, vector<32x64xbf16>, vector<16x64xf32> -> vector<16x64xf32>
    %156 = vector.broadcast %14 : vector<1x64xf32> to vector<16x64xf32>
    %157 = arith.addf %155, %156 : vector<16x64xf32>
    %cst_64 = arith.constant 0.000000e+00 : f32
    %158 = vector.broadcast %cst_64 : f32 to vector<16x64xf32>
    %159 = arith.maximumf %157, %158 : vector<16x64xf32>
    %160 = arith.truncf %159 : vector<16x64xf32> to vector<16x64xbf16>
    %c0_65 = arith.constant 0 : index
    %c0_66 = arith.constant 0 : index
    %c0_67 = arith.constant 0 : index
    %161 = vector.load %arg8[%c0_65, %c0_66, %c0_67] : memref<1x64x32xbf16, #tpu.memory_space<vmem>>, vector<1x64x32xbf16>
    %162 = vector.shape_cast %161 : vector<1x64x32xbf16> to vector<64x32xbf16>
    %cst_68 = arith.constant dense<0.000000e+00> : vector<16x32xf32>
    %163 = tpu.matmul %160, %162, %cst_68 {dimension_numbers = #tpu.dot_dimension_numbers<[1], [0], [0], [1], [0, 0, 1, 1], [], []>} : vector<16x64xbf16>, vector<64x32xbf16>, vector<16x32xf32> -> vector<16x32xf32>
    %164 = vector.broadcast %16 : vector<1x32xf32> to vector<16x32xf32>
    %165 = arith.addf %163, %164 : vector<16x32xf32>
    %166 = arith.addf %151, %165 : vector<16x32xf32>
    %cst_69 = arith.constant dense<0.000000e+00> : vector<16xf32>
    %167 = vector.multi_reduction <add>, %166, %cst_69 [1] : vector<16x32xf32> to vector<16xf32>
    %168 = vector.shape_cast %167 : vector<16xf32> to vector<16x1xf32>
    %cst_70 = arith.constant 3.200000e+01 : f32
    %169 = vector.broadcast %cst_70 : f32 to vector<16x1xf32>
    %170 = arith.divf %168, %169 : vector<16x1xf32>
    %171 = vector.broadcast %170 : vector<16x1xf32> to vector<16x32xf32>
    %172 = arith.subf %166, %171 : vector<16x32xf32>
    %173 = arith.mulf %172, %172 : vector<16x32xf32>
    %cst_71 = arith.constant dense<0.000000e+00> : vector<16xf32>
    %174 = vector.multi_reduction <add>, %173, %cst_71 [1] : vector<16x32xf32> to vector<16xf32>
    %175 = vector.shape_cast %174 : vector<16xf32> to vector<16x1xf32>
    %cst_72 = arith.constant 3.200000e+01 : f32
    %176 = vector.broadcast %cst_72 : f32 to vector<16x1xf32>
    %177 = arith.divf %175, %176 : vector<16x1xf32>
    %178 = vector.broadcast %170 : vector<16x1xf32> to vector<16x32xf32>
    %179 = arith.subf %166, %178 : vector<16x32xf32>
    %cst_73 = arith.constant 9.99999974E-6 : f32
    %180 = vector.broadcast %cst_73 : f32 to vector<16x1xf32>
    %181 = arith.addf %177, %180 : vector<16x1xf32>
    %182 = math.rsqrt %181 : vector<16x1xf32>
    %183 = vector.broadcast %182 : vector<16x1xf32> to vector<16x32xf32>
    %184 = arith.mulf %179, %183 : vector<16x32xf32>
    %185 = vector.broadcast %18 : vector<1x32xf32> to vector<16x32xf32>
    %186 = arith.mulf %184, %185 : vector<16x32xf32>
    %187 = vector.broadcast %20 : vector<1x32xf32> to vector<16x32xf32>
    %188 = arith.addf %186, %187 : vector<16x32xf32>
    %189 = vector.shape_cast %188 : vector<16x32xf32> to vector<2x8x32xf32>
    %c0_74 = arith.constant 0 : index
    %c0_75 = arith.constant 0 : index
    %c0_76 = arith.constant 0 : index
    %190 = vector.load %arg10[%c0_74, %c0_75, %c0_76] : memref<2x8x32xf32, #tpu.memory_space<vmem>>, vector<2x8x32xf32>
    tpu.vector_store %arg10[%c0_74, %c0_75, %c0_76], %189 {strides = array<i32>} : memref<2x8x32xf32, #tpu.memory_space<vmem>>, vector<2x8x32xf32>,
    return
  }
  func.func @transform_0(%arg0: i32, %arg1: i32) -> (i32, i32, i32) {
    %c0_i32 = arith.constant 0 : i32
    %c0_i32_0 = arith.constant 0 : i32
    %c0_i32_1 = arith.constant 0 : i32
    return %arg0, %c0_i32, %c0_i32_0 : i32, i32, i32
  }
  func.func @transform_1(%arg0: i32, %arg1: i32) -> (i32, i32) {
    %c0_i32 = arith.constant 0 : i32
    %c0_i32_0 = arith.constant 0 : i32
    %c0_i32_1 = arith.constant 0 : i32
    return %c0_i32, %c0_i32_0 : i32, i32
  }
  func.func @transform_2(%arg0: i32, %arg1: i32) -> (i32, i32, i32) {
    %c0_i32 = arith.constant 0 : i32
    %c0_i32_0 = arith.constant 0 : i32
    %c0_i32_1 = arith.constant 0 : i32
    return %arg0, %c0_i32, %c0_i32_0 : i32, i32, i32
  }
  func.func @transform_3(%arg0: i32, %arg1: i32) -> (i32, i32, i32) {
    %c0_i32 = arith.constant 0 : i32
    %c0_i32_0 = arith.constant 0 : i32
    %c0_i32_1 = arith.constant 0 : i32
    return %arg1, %c0_i32, %c0_i32_0 : i32, i32, i32
  }
  func.func @transform_4(%arg0: i32, %arg1: i32) -> (i32, i32, i32) {
    %c0_i32 = arith.constant 0 : i32
    %c0_i32_0 = arith.constant 0 : i32
    %c0_i32_1 = arith.constant 0 : i32
    return %arg1, %c0_i32, %c0_i32_0 : i32, i32, i32
  }
  func.func @transform_5(%arg0: i32, %arg1: i32) -> (i32, i32, i32) {
    %c0_i32 = arith.constant 0 : i32
    %c0_i32_0 = arith.constant 0 : i32
    %c0_i32_1 = arith.constant 0 : i32
    return %arg1, %c0_i32, %c0_i32_0 : i32, i32, i32
  }
  func.func @transform_6(%arg0: i32, %arg1: i32) -> (i32, i32, i32) {
    %c0_i32 = arith.constant 0 : i32
    %c0_i32_0 = arith.constant 0 : i32
    %c0_i32_1 = arith.constant 0 : i32
    return %arg1, %c0_i32, %c0_i32_0 : i32, i32, i32
  }
  func.func @transform_7(%arg0: i32, %arg1: i32) -> (i32, i32, i32) {
    %c0_i32 = arith.constant 0 : i32
    %c0_i32_0 = arith.constant 0 : i32
    %c0_i32_1 = arith.constant 0 : i32
    return %arg1, %c0_i32, %c0_i32_0 : i32, i32, i32
  }
  func.func @transform_8(%arg0: i32, %arg1: i32) -> (i32, i32, i32) {
    %c0_i32 = arith.constant 0 : i32
    %c0_i32_0 = arith.constant 0 : i32
    %c0_i32_1 = arith.constant 0 : i32
    return %arg0, %c0_i32, %c0_i32_0 : i32, i32, i32
  }
}

</mosaic_0001>

<bundles_post_ra>
// kernel: tpu_custom_call.1
= control target key start
LH: loop header
LB: loop body
LE: loop exit
PB: predicated region body
PF: predicated region fallthrough
CT: control target
= control target key end

     0   :  { %s2271_s0 = inlined_call_operand.hbm [shape: f32[2,8,32], index: 0, kind: input, shape index: {}]   ;;  %s2272_s1 = inlined_call_operand.hbm [shape: f32[8,8], index: 1, kind: input, shape index: {}]   ;;  %s2273_s2 = inlined_call_operand.hbm [shape: f32[2,1,8], index: 2, kind: input, shape index: {}]   ;;  %s2274_s3 = inlined_call_operand.vmem [shape: bf16[2,32,96], index: 3, kind: input, shape index: {}]   ;;  %s2275_s4 = inlined_call_operand.vmem [shape: bf16[2,32,32], index: 4, kind: input, shape index: {}]   ;;  %s2276_s5 = inlined_call_operand.vmem [shape: bf16[2,32,64], index: 5, kind: input, shape index: {}]   ;;  %s2277_s6 = inlined_call_operand.vmem [shape: bf16[2,64,32], index: 6, kind: input, shape index: {}]   ;;  %s2278_s7 = inlined_call_operand.hbm [shape: f32[2,8,96], index: 7, kind: input, shape index: {}]   ;;  %s2279_s8 = inlined_call_operand.hbm [shape: f32[2,8,32], index: 8, kind: output, shape index: {}]  }
   0x1   :  { %2281 = sst [smem:[#allocation16_spill]] %s2271_s0 }
   0x2   :  { %13 = vsyncpa [#allocation4], 0 }
   0x3   :  { %14 = vsyncpa [#allocation7], 0 }
   0x4   :  { %15 = vsyncpa [#allocation10], 0 }
   0x5   :  { %17 = vsyncpa [#allocation10 + $0x1], 0 }
   0x6   :  { %18 = vsyncpa [#allocation5], 0  ;;  %s1973_s27 = smov 0   ;;  %s1975_s28 = smov 0  }
   0x7   :  { %s1977_s29 = smov 0   ;;  %s1979_s30 = smov 0  }
   0x8   :  { %s1981_s9 = smov 0   ;;  %s1983_s10 = smov 0  }
   0x9 LB: > { %s2280_s11 = sadd.s32 4294967295, %s1902_s10   ;;  %p233_p0 = scmp.ne.s32.totalorder %s1886_s28, %s1882_s27  ;;  %s1902_s10 = sphi %s1983_s10, %s24_s10   ;;  %s1898_s9 = sphi %s1981_s9, %s2292_s9   ;;  %s1894_s30 = sphi %s1979_s30, %s2291_s30   ;;  %s1890_s29 = sphi %s1977_s29, %s2290_s29   ;;  %s1886_s28 = sphi %s1975_s28, %s2289_s28   ;;  %s1882_s27 = sphi %s1973_s27, %s2288_s27  }
   0xa   : > { %p2005_p1 = scmp.eq.s32.totalorder %s2280_s11, 0  ;;  %p1428_p2 = scmp.ge.s32.totalorder %s1902_s10, 1 }
   0xb   : > { %p270_p3 = scmp.lt.s32.totalorder %s1902_s10, 3  ;;  %s299_s16 = sshll.u32 %s2272_s1, 4  ;;  %s300_s16 = int_to_ptr.hbm [resolvable:$true] %s299_s16 }
   0xc   : > { %p2013_p4 = por %p2005_p1, %p233_p0  ;;  %s1904_s18 = smov [#allocation6]  }
   0xd   : > { %p2020_p5 = pnand %p1428_p2, %p270_p3  ;;  %s301_s19 = sshll.u32 %s1904_s18, 4  ;;  %s302_s19 = int_to_ptr.vmem [resolvable:$true] %s301_s19 }
   0xe   : > { %s2286_s0 = sld [smem:[#allocation16_spill]]  ;;  %s1905_s24 = smov [#allocation3]  }
   0xf   : > { %p1545_p6 = pneg %p2020_p5  ;;  %s286_s25 = sshll.u32 %s1905_s24, 4  ;;  %s287_s25 = int_to_ptr.vmem [resolvable:$true] %s286_s25 }
  0x10   : > { %s1906_s26 = smov 128   ;;  %s1907_s27 = smov 8  }
  0x11   : > { %p2028_p7 = pnand %p1545_p6, %p2005_p1  ;;  %s312_s18 = sshll.u32 %s2273_s2, 4  ;;  %s313_s18 = int_to_ptr.hbm [resolvable:$true] %s312_s18 }
  0x12   : > { %s1909_s21 = smov 16   ;;  %s1910_s22 = smov 1  }
  0x13   : > { %1551 = dma.hbm_to_vmem [thread:$0]  (!%p2028_p7), %s300_s16, 128, %s302_s19, [#allocation7]  }
  0x14   : > { %s284_s23 = sshll.u32 %s2286_s0, 4  ;;  %s1908_s16 = smov [#allocation8]   ;;  %s285_s23 = int_to_ptr.hbm [resolvable:$true] %s284_s23 }
  0x15   : > { %1548 = dma.hbm_to_vmem [thread:$0]  (!%p2028_p7), %s285_s23, 256, %s287_s25, [#allocation4], %s1906_s26, %s1906_s26, %s1907_s27  }
  0x16   : > { %s314_s19 = sshll.u32 %s1908_s16, 4  ;;  %s220_s24 = sadd.s32 1, %s1890_s29  ;;  %s315_s19 = int_to_ptr.vmem [resolvable:$true] %s314_s19 }
  0x17   : > { %1554 = dma.hbm_to_vmem [thread:$0]  (!%p2028_p7), %s313_s18, 32, %s315_s19, [#allocation7], %s1909_s21, %s1909_s21, %s1910_s22  }
  0x18   : > { %s33_s11 = sadd.s32 1, %s1898_s9  ;;  %p227_p8 = scmp.ne.s32.totalorder %s1890_s29, %s1886_s28 }
  0x19   : > { %p34_p9 = scmp.ge.s32.totalorder %s33_s11, 2  ;;  %p228_p10 = scmp.eq.s32.totalorder %s1902_s10, 0 }
  0x1a   : > { %p1562_p11 = scmp.lt.s32.totalorder %s1902_s10, 2  ;;  %s360_s23 = sand.u32 1, %s1890_s29  }
  0x1b   : > { %s2294_s11 = smov (%p34_p9, %s33_s11), 0  ;;  %p229_p12 = por %p228_p10, %p227_p8 }
  0x1c   : > { %s217_s25 = ssub.s32 %s1898_s9, %s2294_s11  ;;  %s1433_s26 = sshll.u32 %s360_s23, 3 }
  0x1d   : > { %p218_p13 = scmp.eq.s32.totalorder %s217_s25, 0  ;;  %s1434_s27 = sshll.u32 %s1898_s9, 3 }
  0x1e   : > { %s364_s14 = scalar_lea.vmem [#allocation9], %s1433_s26  ;;  %s368_s19 = scalar_lea.hbm %s2278_s7, %s1434_s27 }
  0x1f   : > { %s372_s20 = sshll.u32 %s364_s14, 4  ;;  %s370_s21 = sshll.u32 %s368_s19, 4  ;;  %s373_s20 = int_to_ptr.vmem [resolvable:$true] %s372_s20  ;;  %s371_s21 = int_to_ptr.hbm [resolvable:$true] %s370_s21 }
  0x20   : > { %s2057_s15 = scalar_select %p218_p13, %s1890_s29, %s220_s24  }
  0x21   : > { %p1556_p0 = pnand %p1562_p11, %p229_p12  ;;  %s361_s22 = scalar_lea.sflag [#allocation10], %s360_s23 }
  0x22   : > { %381 = sbr.rel (%p2020_p5) target bundleno = 1886 (0x75e), region = 52 }
  0x23   : > { %1558 = dma.hbm_to_vmem [thread:$0]  (!%p1556_p0), %s371_s21, 128, %s373_s20, %s361_s22  }
  0x27   : > { %1865 = dma.done.wait (%p2005_p1), [#allocation4], 256  }
  0x28   : > { %1867 = vsyncadd (%p2005_p1), [#allocation4], 4294967040 }
  0x29   : > { %1869 = dma.done.wait (%p2005_p1), [#allocation7], 160  }
  0x2a   : > { %1871 = vsyncadd (%p2005_p1), [#allocation7], 4294967136  ;;  %s398_s24 = sand.u32 1, %s1886_s28  }
  0x2b   : > { %s1439_s23 = sshll.u32 %s398_s24, 3  ;;  %s399_s25 = scalar_lea.sflag [#allocation10], %s398_s24 }
  0x2c   : > { %s2075_s26 = scalar_lea.vmem [#allocation9], %s1439_s23 }
  0x2d   : > { %1873 = dma.done.wait (%p2013_p4), %s399_s25, 128  }
  0x2e   : > { %1875 = vsyncadd (%p2013_p4), %s399_s25, 4294967168  ;;  %p453_p2 = scmp.lt.s32.totalorder %s1894_s30, 1  ;;  %p1448_p1 = scmp.ne.s32.totalorder %s1894_s30, 0 }
  0x30   : > { %s454_s17 = scalar_select %p453_p2, %s1894_s30, 1 }
  0x31   : > { %478 = sbr.rel (%p1448_p1) target bundleno = 57 (0x39), region = 72 }
  0x32   : > { %s1513_s27 = sshll.u32 %s454_s17, 4  ;;  %s1516_s14 = sshll.u32 %s454_s17, 5 }
  0x33   : > { %s457_s18 = scalar_lea.vmem %s2274_s3, %s1513_s27  ;;  %s2089_s21 = scalar_lea.vmem %s2275_s4, %s1513_s27 }
  0x34   : > { %s2094_s13 = scalar_lea.vmem %s2276_s5, %s1513_s27  ;;  %s2099_s0 = scalar_lea.vmem %s2277_s6, %s1516_s14 }
  0x36   : > { %v479_v0 = vld [vmem:[#allocation3] sm:$0xff]  ;;  %vm481_vm0 = vcmask 261120   ;;  %v480_v1 = vld [vmem:[#allocation3 + $0x8] sm:$0xff] }
  0x37   : > { %482 = vst.msk [vmem:[#allocation11] sm:$0xff] %vm481_vm0, %v479_v0 }
  0x38   : > { %483 = vst.msk [vmem:[#allocation11 + $0x8] sm:$0xff] %vm481_vm0, %v480_v1 }
  0x39 PF: > { %v1518_v2 = vld [vmem:[%s457_s18 + $0x8] sm:$0xff]  ;;  %v1517_v3 = vld [vmem:[%s457_s18] sm:$0xff]  ;;  %vm512_vm1 = vcmask 261120   ;;  %s1911_s30 = smov 120   ;;  %s1912_s17 = smov 88   ;;  %vm548_vm2 = vcmask 64512  }
  0x3a   : > { %522 = vmatpush.bf16.msra.mxu0 %v1518_v2  ;;  %v1640_v7 = vld [vmem:[%s2075_s26] ss:$0 sm:$0xff]  ;;  %s1913_s27 = smov 96   ;;  %s1914_s14 = smov 112   ;;  %vm619_vm3 = vcmask 1043456   ;;  %v530_v45 = vld [vmem:[#allocation6] sm:$0xff] }
  0x3b   : > { %s1915_s12 = smov 80   ;;  %s1916_s20 = smov 72   ;;  %v1641_v44 = vld [vmem:[#allocation8] ss:$0 sm:$0xff]  ;;  %v1642_v54 = vld [vmem:[#allocation8 + $0x1] ss:$0 sm:$0xff] }
  0x3c   : > { %s1917_s18 = smov 104   ;;  %s1918_s16 = smov 56   ;;  %v539_v46 = vadd.f32 %v1641_v44, %v530_v45  ;;  %v540_v56 = vadd.f32 %v1642_v54, %v530_v45  ;;  %vm781_vm4 = vcmask 130112   ;;  %vm904_vm5 = vcmask 195712  }
  0x3d   : > { %s1919_s19 = smov 64   ;;  %s1920_s22 = smov 48   ;;  %vm1027_vm6 = vcmask 261312   ;;  %vm1197_vm14 = vcmask 523264  }
  0x3e   : > { %v2102_v4 = vld [vmem:[#allocation11] sm:$0xff]  ;;  %523 = vmatpush.bf16.msra.mxu0 %v1517_v3  ;;  %s1921_s24 = smov 40   ;;  %s1922_s23 = smov 8  }
  0x3f   : > { %v2104_v5 = vld [vmem:[#allocation11 + $0x8] sm:$0xff]  ;;  %s1923_s25 = smov 16  }
  0x40   : > { %v494_v6 = vpack.c.bf16 %v2104_v5, %v2102_v4 }
  0x42   : > { %1457 = vmatmul.msk.bf16.vlgmr.msra.gmra.mxu0 %vm512_vm1, %v494_v6 }
  0xbf   : > { %v525_v8 = vpop.f32.mrf.mxu0 }
  0xc0   : > { %v526_v9 = vadd.f32 %v1640_v7, %v525_v8 }
  0xc2   : > { %v541_v10 = vpack.c.bf16 %v526_v9, %v526_v9 }
  0xc4   : > { %v544_v11 = vunpack.c.l.b16 %v541_v10 }
  0xc6   : > { %v2110_v12 = vpack.c.b16 %v544_v11, %v544_v11 }
  0xc7   : > { %v527_v13 = vpop.f32.mrf.mxu0 }
  0xc8   : > { %v528_v14 = vadd.f32 %v1640_v7, %v527_v13  ;;  %661 = vrot.lane.b32.xlu2 %v2110_v12, %s1911_s30  ;;  %663 = vrot.lane.b32.xlu1 %v2110_v12, %s1912_s17 }
  0xc9   : > { %546 = vrot.lane.b32.xlu0 %v2110_v12, %s1913_s27 }
  0xca   : > { %v542_v15 = vpack.c.bf16 %v528_v14, %v528_v14 }
  0xcc   : > { %v569_v16 = vunpack.c.l.b16 %v542_v15 }
  0xce   : > { %v2115_v17 = vpack.c.b16 %v569_v16, %v569_v16 }
  0xd0   : > { %684 = vrot.lane.b32.xlu2 %v2115_v17, %s1911_s30  ;;  %686 = vrot.lane.b32.xlu1 %v2115_v17, %s1912_s17  ;;  %s1924_s30 = smov 24  }
  0xd1   : > { %571 = vrot.lane.b32.xlu0 %v2115_v17, %s1913_s27  ;;  %s2287_s27 = sadd.s32 4294967295, %s1902_s10  }
  0xd2   : > { %p1566_p3 = scmp.eq.s32.totalorder %s2287_s27, 1 }
  0xd8   : > { %784 = vrot.lane.b32.xlu2 %v2110_v12, %s1914_s14  ;;  %809 = vrot.lane.b32.xlu1 %v2115_v17, %s1915_s12 }
  0xd9   : > { %786 = vrot.lane.b32.xlu0 %v2110_v12, %s1915_s12 }
  0xe0   : > { %932 = vrot.lane.b32.xlu2 %v2115_v17, %s1916_s20  ;;  %909 = vrot.lane.b32.xlu1 %v2110_v12, %s1916_s20 }
  0xe1   : > { %807 = vrot.lane.b32.xlu0 %v2115_v17, %s1914_s14  ;;  %s1927_s14 = smov 128  }
  0xe8   : > { %930 = vrot.lane.b32.xlu1 %v2115_v17, %s1917_s18 }
  0xe9   : > { %907 = vrot.lane.b32.xlu0 %v2110_v12, %s1917_s18 }
  0xf0   : > { %750 = vrot.lane.b32.xlu1 %v2115_v17, %s1918_s16 }
  0xf1   : > { %614 = vrot.lane.b32.xlu0 %v2110_v12, %s1919_s19 }
  0xf9   : > { %636 = vrot.lane.b32.xlu0 %v2115_v17, %s1919_s19 }
 0x122   : > { %v662_v18 = vpop.permute.xlu2 %661 }
 0x12a   : > { %v685_v23 = vpop.permute.xlu2 %684 }
 0x132   : > { %v785_v28 = vpop.permute.xlu2 %784 }
 0x13a   : > { %v664_v19 = vpop.permute.xlu1 %663  ;;  %v933_v33 = vpop.permute.xlu2 %932 }
 0x13b   : > { %v547_v20 = vpop.permute.xlu0 %546  ;;  %v669_v21 = vsel %vm548_vm2, %v664_v19, 0  ;;  %v938_v37 = vsel %vm548_vm2, %v933_v33, 0 }
 0x13c   : > { %v553_v22 = vsel %vm548_vm2, %v547_v20, 0  ;;  %678 = vmatpush.bf16.xpose.msrb.mxu0 %v669_v21 }
 0x13d   : > { %562 = vmatpush.bf16.xpose.msra.mxu1 %v553_v22 }
 0x142   : > { %v687_v24 = vpop.permute.xlu1 %686 }
 0x143   : > { %v572_v25 = vpop.permute.xlu0 %571  ;;  %1462 = vmatmul.msk.bf16.vlgmr.msrb.gmra.mxu0 %vm548_vm2, %v662_v18  ;;  %v692_v26 = vsel %vm548_vm2, %v687_v24, 0 }
 0x144   : > { %1458 = vmatmul.msk.bf16.vlgmr.msra.gmra.mxu1 %vm548_vm2, %v541_v10  ;;  %v577_v27 = vsel %vm548_vm2, %v572_v25, 0 }
 0x145   : > { %586 = vmatpush.bf16.xpose.msra.mxu2 %v577_v27  ;;  %701 = vmatpush.bf16.xpose.msrb.mxu1 %v692_v26 }
 0x14a   : > { %v810_v29 = vpop.permute.xlu1 %809 }
 0x14b   : > { %v815_v30 = vsel %vm548_vm2, %v810_v29, 0  ;;  %v787_v31 = vpop.permute.xlu0 %786 }
 0x14c   : > { %v792_v32 = vsel %vm548_vm2, %v787_v31, 0  ;;  %1459 = vmatmul.msk.bf16.vlgmr.msra.gmra.mxu2 %vm548_vm2, %v542_v15 }
 0x14d   : > { %824 = vmatpush.bf16.xpose.msra.mxu1 %v815_v30  ;;  %801 = vmatpush.bf16.xpose.msra.mxu0 %v792_v32 }
 0x152   : > { %v910_v34 = vpop.permute.xlu1 %909 }
 0x153   : > { %v915_v35 = vsel %vm548_vm2, %v910_v34, 0  ;;  %v808_v36 = vpop.permute.xlu0 %807 }
 0x154   : > { %1463 = vmatmul.msk.bf16.vlgmr.msrb.gmra.mxu1 %vm548_vm2, %v685_v23  ;;  %1466 = vmatmul.msk.bf16.vlgmr.msra.gmra.mxu0 %vm548_vm2, %v785_v28 }
 0x155   : > { %947 = vmatpush.bf16.xpose.msrb.mxu1 %v938_v37  ;;  %924 = vmatpush.bf16.xpose.msrb.mxu0 %v915_v35 }
 0x15a   : > { %v931_v43 = vpop.permute.xlu1 %930 }
 0x15b   : > { %v908_v38 = vpop.permute.xlu0 %907 }
 0x162   : > { %v751_v27 = vpop.permute.xlu1 %750 }
 0x163   : > { %v615_v39 = vpop.permute.xlu0 %614  ;;  %v756_v33 = vsel %vm619_vm3, %v751_v27, 0 }
 0x164   : > { %1467 = vmatmul.msk.bf16.vlgmr.msra.gmra.mxu1 %vm548_vm2, %v808_v36  ;;  %1470 = vmatmul.msk.bf16.vlgmr.msrb.gmra.mxu0 %vm548_vm2, %v908_v38  ;;  %v621_v40 = vsel %vm619_vm3, %v615_v39, 0 }
 0x165   : > { %630 = vmatpush.bf16.msra.mxu3 %v621_v40 }
 0x16b   : > { %v637_v41 = vpop.permute.xlu0 %636 }
 0x16c   : > { %v642_v42 = vsel %vm619_vm3, %v637_v41, 0 }
 0x16d   : > { %651 = vmatpush.bf16.msrb.mxu3 %v642_v42 }
 0x174   : > { %1471 = vmatmul.msk.bf16.vlgmr.msrb.gmra.mxu1 %vm548_vm2, %v931_v43 }
 0x1c0   : > { %v680_v47 = vpop.f32.mrf.mxu0 }
 0x1c1   : > { %v564_v48 = vpop.f32.mrf.mxu1  ;;  %v681_v49 = vadd.f32 %v680_v47, %v539_v46 }
 0x1c2   : > { %v565_v50 = vadd.f32 %v564_v48, %v539_v46 }
 0x1c3   : > { %v707_v51 = vsel %vm548_vm2, %v681_v49, -inf }
 0x1c4   : > { %708 = vmax.xlane.f32.xlu0 %v707_v51  ;;  %v592_v52 = vsel %vm548_vm2, %v565_v50, -inf }
 0x1c5   : > { %593 = vmax.xlane.f32.xlu2 %v592_v52 }
 0x1c8   : > { %v682_v53 = vpop.f32.mrf.mxu0 }
 0x1c9   : > { %v566_v55 = vpop.f32.mrf.mxu1 }
 0x1cf   : > { %v588_v57 = vpop.f32.mrf.mxu2 }
 0x1d0   : > { %v589_v58 = vadd.f32 %v588_v57, %v540_v56 }
 0x1d1   : > { %v703_v59 = vpop.f32.mrf.mxu1  ;;  %v803_v60 = vpop.f32.mrf.mxu0 }
 0x1d2   : > { %v804_v61 = vadd.f32 %v803_v60, %v539_v46  ;;  %v595_v62 = vsel %vm548_vm2, %v589_v58, -inf  ;;  %v2158_v11 = vadd.f32 %v703_v59, %v540_v56 }
 0x1d3   : > { %596 = vmax.xlane.f32.xlu1 %v595_v62 }
 0x1d4   : > { %v830_v63 = vsel %vm548_vm2, %v804_v61, -inf  ;;  %v710_v13 = vsel %vm548_vm2, %v2158_v11, -inf }
 0x1d5   : > { %831 = vmax.xlane.f32.xlu0 %v830_v63 }
 0x1d7   : > { %v590_v0 = vpop.f32.mrf.mxu2 }
 0x1d9   : > { %v705_v1 = vpop.f32.mrf.mxu1  ;;  %v805_v2 = vpop.f32.mrf.mxu0 }
 0x1dd   : > { %729 = vrot.lane.b32.xlu2 %v2110_v12, %s1918_s16 }
 0x1e1   : > { %v826_v3 = vpop.f32.mrf.mxu1  ;;  %v926_v6 = vpop.f32.mrf.mxu0 }
 0x1e2   : > { %v2162_v14 = vadd.f32 %v826_v3, %v540_v56  ;;  %v2168_v18 = vadd.f32 %v926_v6, %v539_v46 }
 0x1e4   : > { %v833_v15 = vsel %vm548_vm2, %v2162_v14, -inf  ;;  %v953_v20 = vsel %vm548_vm2, %v2168_v18, -inf }
 0x1e9   : > { %852 = vrot.lane.b32.xlu0 %v2110_v12, %s1920_s22  ;;  %v828_v7 = vpop.f32.mrf.mxu1  ;;  %v928_v8 = vpop.f32.mrf.mxu0 }
 0x1ec   : > { %873 = vrot.lane.b32.xlu1 %v2115_v17, %s1920_s22 }
 0x1f1   : > { %v949_v9 = vpop.f32.mrf.mxu1 }
 0x1f2   : > { %v2166_v16 = vadd.f32 %v949_v9, %v540_v56 }
 0x1f4   : > { %v956_v19 = vsel %vm548_vm2, %v2166_v16, -inf }
 0x1f9   : > { %v951_v10 = vpop.f32.mrf.mxu1 }
 0x206   : > { %711 = vmax.xlane.f32.xlu2 %v710_v13 }
 0x20e   : > { %834 = vmax.xlane.f32.xlu2 %v833_v15 }
 0x213   : > { %957 = vmax.xlane.f32.xlu0 %v956_v19 }
 0x216   : > { %954 = vmax.xlane.f32.xlu1 %v953_v20 }
 0x226   : > { %975 = vrot.lane.b32.xlu2 %v2110_v12, %s1921_s24 }
 0x22f   : > { %996 = vrot.lane.b32.xlu1 %v2115_v17, %s1921_s24 }
 0x237   : > { %v709_v21 = vpop.xlane.xlu0 %708 }
 0x238   : > { %v594_v22 = vpop.xlane.xlu2 %593  ;;  %v713_v23 = vsub.f32 %v681_v49, %v709_v21 }
 0x239   : > { %v598_v24 = vsub.f32 %v565_v50, %v594_v22 }
 0x23a   : > { %v715_v25 = vmul.f32 1.442695, %v713_v23 }
 0x23b   : > { %v600_v26 = vmul.f32 1.442695, %v598_v24 }
 0x23c   : > { %1650 = vpow2.f32 %v715_v25 }
 0x23d   : > { %1652 = vpow2.f32 %v600_v26 }
 0x240   : > { %v730_v28 = vpop.permute.xlu2 %729 }
 0x241   : > { %v735_v29 = vsel %vm619_vm3, %v730_v28, 0 }
 0x242   : > { %v1651_v30 = vpop.eup %1650  ;;  %744 = vmatpush.bf16.msrb.mxu2 %v735_v29 }
 0x243   : > { %v1653_v31 = vpop.eup %1652  ;;  %v719_v32 = vsel %vm548_vm2, %v1651_v30, 0.0  ;;  %v727_v12 = vpack.c.bf16 %v1651_v30, %v1651_v30 }
 0x244   : > { %720 = vadd.xlane.f32.xlu0 %v719_v32  ;;  %v612_v17 = vpack.c.bf16 %v1653_v31, %v1653_v31  ;;  %v604_v46 = vsel %vm548_vm2, %v1653_v31, 0.0 }
 0x245   : > { %1464 = vmatmul.msk.bf16.vlgmr.msrb.gmra.mxu2 %vm548_vm2, %v727_v12 }
 0x246   : > { %v597_v34 = vpop.xlane.xlu1 %596  ;;  %1460 = vmatmul.msk.bf16.vlgmr.msra.gmra.mxu3 %vm548_vm2, %v612_v17 }
 0x247   : > { %v599_v35 = vsub.f32 %v589_v58, %v597_v34  ;;  %765 = vmatpush.bf16.msra.mxu3 %v756_v33 }
 0x248   : > { %v832_v36 = vpop.xlane.xlu0 %831 }
 0x249   : > { %v602_v37 = vmul.f32 1.442695, %v599_v35  ;;  %v836_v38 = vsub.f32 %v804_v61, %v832_v36 }
 0x24b   : > { %1654 = vpow2.f32 %v602_v37  ;;  %v838_v39 = vmul.f32 1.442695, %v836_v38 }
 0x24d   : > { %1656 = vpow2.f32 %v838_v39 }
 0x251   : > { %v1655_v40 = vpop.eup %1654 }
 0x252   : > { %v613_v43 = vpack.c.bf16 %v1655_v40, %v1655_v40  ;;  %v607_v50 = vsel %vm548_vm2, %v1655_v40, 0.0 }
 0x253   : > { %v1657_v41 = vpop.eup %1656 }
 0x254   : > { %v842_v42 = vsel %vm548_vm2, %v1657_v41, 0.0  ;;  %v850_v47 = vpack.c.bf16 %v1657_v41, %v1657_v41 }
 0x255   : > { %843 = vadd.xlane.f32.xlu0 %v842_v42 }
 0x256   : > { %1461 = vmatmul.msk.bf16.vlgmr.msrb.gmra.mxu3 %vm548_vm2, %v613_v43 }
 0x25b   : > { %v853_v44 = vpop.permute.xlu0 %852 }
 0x25c   : > { %v858_v45 = vsel %vm619_vm3, %v853_v44, 0 }
 0x25d   : > { %605 = vadd.xlane.f32.xlu0 %v604_v46  ;;  %867 = vmatpush.bf16.msra.mxu2 %v858_v45 }
 0x25e   : > { %v874_v48 = vpop.permute.xlu1 %873 }
 0x25f   : > { %v879_v49 = vsel %vm619_vm3, %v874_v48, 0 }
 0x260   : > { %1468 = vmatmul.msk.bf16.vlgmr.msra.gmra.mxu2 %vm548_vm2, %v850_v47  ;;  %888 = vmatpush.bf16.msrb.mxu3 %v879_v49 }
 0x265   : > { %608 = vadd.xlane.f32.xlu0 %v607_v50 }
 0x279   : > { %v712_v51 = vpop.xlane.xlu2 %711 }
 0x27a   : > { %v714_v52 = vsub.f32 %v2158_v11, %v712_v51 }
 0x27c   : > { %v717_v53 = vmul.f32 1.442695, %v714_v52 }
 0x27e   : > { %1658 = vpow2.f32 %v717_v53 }
 0x281   : > { %v835_v54 = vpop.xlane.xlu2 %834 }
 0x282   : > { %v837_v55 = vsub.f32 %v2162_v14, %v835_v54 }
 0x284   : > { %v1659_v56 = vpop.eup %1658  ;;  %v840_v57 = vmul.f32 1.442695, %v837_v55 }
 0x285   : > { %v728_v58 = vpack.c.bf16 %v1659_v56, %v1659_v56  ;;  %v722_v59 = vsel %vm548_vm2, %v1659_v56, 0.0 }
 0x286   : > { %1660 = vpow2.f32 %v840_v57  ;;  %723 = vadd.xlane.f32.xlu2 %v722_v59  ;;  %v958_v60 = vpop.xlane.xlu0 %957  ;;  %v1520_v59 = vld [vmem:[%s2089_s21 + $0x8] sm:$0xff] }
 0x287   : > { %1465 = vmatmul.msk.bf16.vlgmr.msra.gmra.mxu3 %vm548_vm2, %v728_v58  ;;  %v960_v2 = vsub.f32 %v2166_v16, %v958_v60  ;;  %1059 = vmatpush.bf16.msra.mxu0 %v1520_v59  ;;  %v1519_v60 = vld [vmem:[%s2089_s21] sm:$0xff] }
 0x289   : > { %v976_v61 = vpop.permute.xlu2 %975  ;;  %v955_v62 = vpop.xlane.xlu1 %954  ;;  %v963_v7 = vmul.f32 1.442695, %v960_v2 }
 0x28a   : > { %v981_v63 = vsel %vm619_vm3, %v976_v61, 0  ;;  %v959_v0 = vsub.f32 %v2168_v18, %v955_v62 }
 0x28b   : > { %990 = vmatpush.bf16.msrb.mxu2 %v981_v63  ;;  %1060 = vmatpush.bf16.msra.mxu0 %v1519_v60 }
 0x28c   : > { %v1661_v1 = vpop.eup %1660  ;;  %v961_v3 = vmul.f32 1.442695, %v959_v0 }
 0x28d   : > { %v845_v6 = vsel %vm548_vm2, %v1661_v1, 0.0  ;;  %v851_v9 = vpack.c.bf16 %v1661_v1, %v1661_v1 }
 0x28e   : > { %1662 = vpow2.f32 %v961_v3  ;;  %846 = vadd.xlane.f32.xlu1 %v845_v6  ;;  %v1643_v6 = vld [vmem:[%s2075_s26 + $0x1] ss:$0 sm:$0xff] }
 0x28f   : > { %1664 = vpow2.f32 %v963_v7 }
 0x294   : > { %v1663_v8 = vpop.eup %1662 }
 0x295   : > { %v973_v10 = vpack.c.bf16 %v1663_v8, %v1663_v8  ;;  %v965_v11 = vsel %vm548_vm2, %v1663_v8, 0.0  ;;  %v1665_v13 = vpop.eup %1664 }
 0x296   : > { %966 = vadd.xlane.f32.xlu0 %v965_v11  ;;  %v968_v14 = vsel %vm548_vm2, %v1665_v13, 0.0  ;;  %v974_v18 = vpack.c.bf16 %v1665_v13, %v1665_v13 }
 0x297   : > { %1469 = vmatmul.msk.bf16.vlgmr.msrb.gmra.mxu3 %vm548_vm2, %v851_v9  ;;  %1472 = vmatmul.msk.bf16.vlgmr.msrb.gmra.mxu2 %vm548_vm2, %v973_v10 }
 0x29e   : > { %969 = vadd.xlane.f32.xlu0 %v968_v14 }
 0x2a1   : > { %v997_v15 = vpop.permute.xlu1 %996 }
 0x2a2   : > { %v1002_v16 = vsel %vm619_vm3, %v997_v15, 0 }
 0x2a3   : > { %1011 = vmatpush.bf16.msra.mxu3 %v1002_v16  ;;  %v1925_v16 = vmov 32.0  }
 0x2a7   : > { %1473 = vmatmul.msk.bf16.vlgmr.msra.gmra.mxu3 %vm548_vm2, %v974_v18 }
 0x2b7   : > { %v721_v19 = vpop.xlane.xlu0 %720 }
 0x2b8   : > { %1666 = vrcp.f32 %v721_v19 }
 0x2be   : > { %v1667_v20 = vpop.eup %1666 }
 0x2c8   : > { %v844_v21 = vpop.xlane.xlu0 %843  ;;  %v746_v22 = vpop.f32.mrf.mxu2 }
 0x2c9   : > { %v632_v23 = vpop.f32.mrf.mxu3  ;;  %v771_v24 = vmul.f32 %v1667_v20, %v746_v22 }
 0x2cb   : > { %775 = vrot.lane.b32.xlu2 %v771_v24, %s1922_s23 }
 0x2d0   : > { %v606_v25 = vpop.xlane.xlu0 %605  ;;  %v748_v26 = vpop.f32.mrf.mxu2 }
 0x2d1   : > { %1668 = vrcp.f32 %v606_v25  ;;  %v634_v27 = vpop.f32.mrf.mxu3 }
 0x2d7   : > { %v1669_v28 = vpop.eup %1668 }
 0x2d8   : > { %v609_v29 = vpop.xlane.xlu0 %608  ;;  %v657_v30 = vmul.f32 %v1669_v28, %v632_v23 }
 0x2d9   : > { %1670 = vrcp.f32 %v609_v29  ;;  %v653_v31 = vpop.f32.mrf.mxu3 }
 0x2da   : > { %659 = vst.msk [vmem:[#allocation2] sm:$0xff] %vm548_vm2, %v657_v30  ;;  %1672 = vrcp.f32 %v844_v21 }
 0x2df   : > { %v1671_v32 = vpop.eup %1670 }
 0x2e0   : > { %v658_v12 = vmul.f32 %v1671_v32, %v653_v31  ;;  %v1673_v33 = vpop.eup %1672  ;;  %v1522_v32 = vld [vmem:[%s2094_s13 + $0x8] sm:$0xff] }
 0x2e1   : > { %v655_v17 = vpop.f32.mrf.mxu3  ;;  %1153 = vmatpush.bf16.msra.mxu1 %v1522_v32 }
 0x2e2   : > { %660 = vst.msk [vmem:[#allocation2 + $0x8] sm:$0xff] %vm548_vm2, %v658_v12 }
 0x2e3   : > { %v869_v34 = vpop.f32.mrf.mxu2 }
 0x2e4   : > { %v894_v35 = vmul.f32 %v1673_v33, %v869_v34  ;;  %v1521_v34 = vld [vmem:[%s2094_s13] sm:$0xff] }
 0x2e5   : > { %1154 = vmatpush.bf16.msra.mxu1 %v1521_v34 }
 0x2e6   : > { %898 = vrot.lane.b32.xlu1 %v894_v35, %s1923_s25 }
 0x2eb   : > { %v871_v36 = vpop.f32.mrf.mxu2 }
 0x2f9   : > { %v724_v37 = vpop.xlane.xlu2 %723 }
 0x2fa   : > { %1674 = vrcp.f32 %v724_v37 }
 0x300   : > { %v1675_v38 = vpop.eup %1674 }
 0x301   : > { %v847_v41 = vpop.xlane.xlu1 %846 }
 0x302   : > { %1676 = vrcp.f32 %v847_v41 }
 0x308   : > { %v1677_v44 = vpop.eup %1676 }
 0x309   : > { %v967_v42 = vpop.xlane.xlu0 %966 }
 0x30a   : > { %v767_v39 = vpop.f32.mrf.mxu3  ;;  %1678 = vrcp.f32 %v967_v42 }
 0x30b   : > { %v772_v40 = vmul.f32 %v1675_v38, %v767_v39 }
 0x30d   : > { %777 = vrot.lane.b32.xlu0 %v772_v40, %s1922_s23 }
 0x310   : > { %v1679_v45 = vpop.eup %1678 }
 0x311   : > { %v970_v50 = vpop.xlane.xlu0 %969 }
 0x312   : > { %v769_v43 = vpop.f32.mrf.mxu3  ;;  %1680 = vrcp.f32 %v970_v50  ;;  %v1644_v50 = vld [vmem:[%s2075_s26 + $0x2] ss:$0 sm:$0xff] }
 0x313   : > { %1682 = vrcp.f32 %v1925_v16 }
 0x318   : > { %v1681_v54 = vpop.eup %1680 }
 0x319   : > { %v1683_v18 = vpop.eup %1682 }
 0x31a   : > { %v890_v46 = vpop.f32.mrf.mxu3  ;;  %v992_v47 = vpop.f32.mrf.mxu2  ;;  %v1076_v19 = vmul.f32 32.0, %v1683_v18  ;;  %vm1080_vm7 = vweird.f32 %v1683_v18 }
 0x31b   : > { %v895_v48 = vmul.f32 %v1677_v44, %v890_v46  ;;  %v1017_v49 = vmul.f32 %v1679_v45, %v992_v47 }
 0x31c   : > { %v1077_v20 = vsub.f32 1.0, %v1076_v19 }
 0x31d   : > { %900 = vrot.lane.b32.xlu2 %v895_v48, %s1923_s25  ;;  %1021 = vrot.lane.b32.xlu0 %v1017_v49, %s1924_s30 }
 0x31e   : > { %v1078_v21 = vmul.f32 %v1683_v18, %v1077_v20 }
 0x320   : > { %v1079_v22 = vadd.f32 %v1683_v18, %v1078_v21 }
 0x322   : > { %v892_v51 = vpop.f32.mrf.mxu3  ;;  %v994_v52 = vpop.f32.mrf.mxu2 }
 0x325   : > { %v776_v53 = vpop.permute.xlu2 %775 }
 0x326   : > { %782 = vst.msk [vmem:[#allocation2] sm:$0xff] %vm781_vm4, %v776_v53 }
 0x32a   : > { %v1013_v55 = vpop.f32.mrf.mxu3 }
 0x32b   : > { %v1018_v56 = vmul.f32 %v1681_v54, %v1013_v55  ;;  %v1645_v54 = vld [vmem:[%s2075_s26 + $0x3] ss:$0 sm:$0xff] }
 0x32d   : > { %1023 = vrot.lane.b32.xlu2 %v1018_v56, %s1924_s30 }
 0x332   : > { %v1015_v57 = vpop.f32.mrf.mxu3 }
 0x358   : > { %v899_v58 = vpop.permute.xlu1 %898 }
 0x359   : > { %905 = vst.msk [vmem:[#allocation2] sm:$0xff] %vm904_vm5, %v899_v58 }
 0x377   : > { %v901_v61 = vpop.permute.xlu2 %900 }
 0x37f   : > { %v778_v62 = vpop.permute.xlu0 %777 }
 0x380   : > { %783 = vst.msk [vmem:[#allocation2 + $0x8] sm:$0xff] %vm781_vm4, %v778_v62  ;;  %v1525_v62 = vld [vmem:[%s2099_s0 + $0x10] sm:$0xff] }
 0x381   : > { %906 = vst.msk [vmem:[#allocation2 + $0x8] sm:$0xff] %vm904_vm5, %v901_v61  ;;  %v1526_v61 = vld [vmem:[%s2099_s0 + $0x18] sm:$0xff] }
 0x382   : > { %1205 = vmatpush.bf16.msra.mxu2 %v1526_v61 }
 0x386   : > { %1206 = vmatpush.bf16.msra.mxu2 %v1525_v62 }
 0x387   : > { %v1024_v63 = vpop.permute.xlu2 %1023 }
 0x388   : > { %1029 = vst.msk [vmem:[#allocation2 + $0x8] sm:$0xff] %vm1027_vm6, %v1024_v63  ;;  %v1524_v63 = vld [vmem:[%s2099_s0 + $0x8] sm:$0xff] }
 0x38a   : > { %1207 = vmatpush.bf16.msra.mxu2 %v1524_v63 }
 0x38f   : > { %v1022_v0 = vpop.permute.xlu0 %1021  ;;  %v1031_v2 = vld [vmem:[#allocation2 + $0x8] sm:$0xff] }
 0x390   : > { %1028 = vst.msk [vmem:[#allocation2] sm:$0xff] %vm1027_vm6, %v1022_v0  ;;  %v1523_v0 = vld [vmem:[%s2099_s0] sm:$0xff]  ;;  %s1926_s0 = smov [#allocation11]  }
 0x391   : > { %1208 = vmatpush.bf16.msra.mxu2 %v1523_v0  ;;  %s1277_s21 = sshll.u32 %s1926_s0, 4  ;;  %s1278_s21 = int_to_ptr.vmem [resolvable:$true] %s1277_s21 }
 0x397   : > { %v1030_v1 = vld [vmem:[#allocation2] sm:$0xff] }
 0x398   : > { %v1032_v3 = vpack.c.bf16 %v1031_v2, %v1030_v1  ;;  %v1646_v2 = vld [vmem:[%s2075_s26 + $0x4] ss:$0 sm:$0xff] }
 0x39a   : > { %1482 = vmatmul.msk.bf16.vlgmr.msra.gmra.mxu0 %vm512_vm1, %v1032_v3 }
 0x417   : > { %v1062_v7 = vpop.f32.mrf.mxu0 }
 0x418   : > { %v1063_v8 = vadd.f32 %v1643_v6, %v1062_v7 }
 0x41a   : > { %v1067_v9 = vadd.f32 %v1063_v8, %v2102_v4  ;;  %v2216_v4 = vsel %vm1080_vm7, %v1683_v18, %v1079_v22 }
 0x41c   : > { %v1069_v10 = vsel %vm512_vm1, %v1067_v9, 0.0 }
 0x41d   : > { %1070 = vadd.xlane.f32.xlu0 %v1069_v10 }
 0x41f   : > { %v1064_v11 = vpop.f32.mrf.mxu0 }
 0x420   : > { %v1065_v13 = vadd.f32 %v1643_v6, %v1064_v11  ;;  %v1647_v11 = vld [vmem:[%s2075_s26 + $0x5] ss:$0 sm:$0xff] }
 0x422   : > { %v1068_v14 = vadd.f32 %v1065_v13, %v2104_v5 }
 0x424   : > { %v1072_v15 = vsel %vm512_vm1, %v1068_v14, 0.0 }
 0x425   : > { %1073 = vadd.xlane.f32.xlu1 %v1072_v15 }
 0x490   : > { %v1071_v23 = vpop.xlane.xlu0 %1070 }
 0x491   : > { %v1082_v24 = vmul.f32 %v2216_v4, %v1071_v23 }
 0x493   : > { %v1084_v25 = vsub.f32 %v1067_v9, %v1082_v24 }
 0x495   : > { %v1086_v5 = vmul.f32 %v1084_v25, %v1084_v25 }
 0x497   : > { %v1088_v26 = vsel %vm512_vm1, %v1086_v5, 0.0 }
 0x498   : > { %v1074_v27 = vpop.xlane.xlu1 %1073  ;;  %1089 = vadd.xlane.f32.xlu2 %v1088_v26 }
 0x499   : > { %v1083_v28 = vmul.f32 %v2216_v4, %v1074_v27 }
 0x49b   : > { %v1085_v29 = vsub.f32 %v1068_v14, %v1083_v28 }
 0x49d   : > { %v1087_v30 = vmul.f32 %v1085_v29, %v1085_v29 }
 0x49f   : > { %v1091_v31 = vsel %vm512_vm1, %v1087_v30, 0.0 }
 0x4a0   : > { %1092 = vadd.xlane.f32.xlu0 %v1091_v31 }
 0x50b   : > { %v1090_v12 = vpop.xlane.xlu2 %1089 }
 0x50c   : > { %v1094_v17 = vmul.f32 %v1090_v12, %v2216_v4 }
 0x50e   : > { %v1096_v33 = vadd.f32 1e-05, %v1094_v17 }
 0x510   : > { %1684 = vrsqrt.f32 %v1096_v33  ;;  %vm1104_vm9 = vweird.f32 %v1096_v33 }
 0x513   : > { %v1093_v35 = vpop.xlane.xlu0 %1092 }
 0x514   : > { %v1095_v36 = vmul.f32 %v1093_v35, %v2216_v4 }
 0x516   : > { %v1685_v37 = vpop.eup %1684  ;;  %v1097_v38 = vadd.f32 1e-05, %v1095_v36 }
 0x517   : > { %v1099_v39 = vmul.f32 %v1685_v37, %v1096_v33  ;;  %vm1105_vm8 = vweird.f32 %v1685_v37 }
 0x518   : > { %1686 = vrsqrt.f32 %v1097_v38  ;;  %vm1106_vm10 = vmor %vm1104_vm9, %vm1105_vm8  ;;  %vm1114_vm12 = vweird.f32 %v1097_v38 }
 0x519   : > { %v1100_v40 = vmul.f32 %v1685_v37, %v1099_v39 }
 0x51b   : > { %v1101_v41 = vmul.f32 0.5, %v1100_v40 }
 0x51d   : > { %v1102_v42 = vsub.f32 1.5, %v1101_v41 }
 0x51e   : > { %v1687_v43 = vpop.eup %1686 }
 0x51f   : > { %v1103_v44 = vmul.f32 %v1685_v37, %v1102_v42  ;;  %v1109_v45 = vmul.f32 %v1687_v43, %v1097_v38  ;;  %vm1115_vm11 = vweird.f32 %v1687_v43 }
 0x520   : > { %vm1116_vm13 = vmor %vm1114_vm12, %vm1115_vm11 }
 0x521   : > { %v1110_v46 = vmul.f32 %v1687_v43, %v1109_v45  ;;  %v1107_v47 = vsel %vm1106_vm10, %v1685_v37, %v1103_v44 }
 0x522   : > { %v1118_v51 = vmul.f32 %v1107_v47, %v1084_v25 }
 0x523   : > { %v1111_v48 = vmul.f32 0.5, %v1110_v46  ;;  %v1649_v46 = vld [vmem:[%s2075_s26 + $0x7] ss:$0 sm:$0xff] }
 0x524   : > { %v1121_v55 = vmul.f32 %v1644_v50, %v1118_v51 }
 0x525   : > { %v1112_v49 = vsub.f32 1.5, %v1111_v48 }
 0x526   : > { %v1124_v58 = vadd.f32 %v1645_v54, %v1121_v55 }
 0x527   : > { %v1113_v52 = vmul.f32 %v1687_v43, %v1112_v49 }
 0x529   : > { %v1117_v53 = vsel %vm1116_vm13, %v1687_v43, %v1113_v52  ;;  %v1648_v43 = vld [vmem:[%s2075_s26 + $0x6] ss:$0 sm:$0xff]  ;;  %s1279_s26 = sshll.u32 %s2279_s8, 4  ;;  %s1280_s26 = int_to_ptr.hbm [resolvable:$true] %s1279_s26 }
 0x52a   : > { %v1119_v56 = vmul.f32 %v1117_v53, %v1085_v29 }
 0x52c   : > { %v1122_v57 = vmul.f32 %v1644_v50, %v1119_v56 }
 0x52e   : > { %v1125_v59 = vadd.f32 %v1645_v54, %v1122_v57 }
 0x530   : > { %v1126_v60 = vpack.c.bf16 %v1125_v59, %v1124_v58 }
 0x532   : > { %1491 = vmatmul.msk.bf16.vlgmr.msra.gmra.mxu1 %vm512_vm1, %v1126_v60 }
 0x5af   : > { %v1156_v1 = vpop.f32.mrf.mxu1 }
 0x5b0   : > { %v1157_v3 = vadd.f32 %v1646_v2, %v1156_v1 }
 0x5b2   : > { %v1161_v8 = vmax.f32 %v1157_v3, 0.0 }
 0x5b7   : > { %v1158_v6 = vpop.f32.mrf.mxu1 }
 0x5b8   : > { %v1159_v7 = vadd.f32 %v1646_v2, %v1158_v6 }
 0x5ba   : > { %v1162_v9 = vmax.f32 %v1159_v7, 0.0 }
 0x5bc   : > { %v1163_v10 = vpack.c.bf16 %v1162_v9, %v1161_v8 }
 0x5be   : > { %1508 = vmatmul.msk.bf16.vlgmr.msra.gmra.mxu2 %vm1197_vm14, %v1163_v10 }
 0x641   : > { %v1210_v13 = vpop.f32.mrf.mxu2 }
 0x642   : > { %v1211_v14 = vadd.f32 %v1647_v11, %v1210_v13 }
 0x644   : > { %v1215_v15 = vadd.f32 %v1211_v14, %v1124_v58 }
 0x646   : > { %v1217_v16 = vsel %vm512_vm1, %v1215_v15, 0.0 }
 0x647   : > { %1218 = vadd.xlane.f32.xlu1 %v1217_v16 }
 0x649   : > { %v1212_v18 = vpop.f32.mrf.mxu2 }
 0x64a   : > { %v1213_v19 = vadd.f32 %v1647_v11, %v1212_v18 }
 0x64c   : > { %v1216_v20 = vadd.f32 %v1213_v19, %v1125_v59 }
 0x64e   : > { %v1220_v21 = vsel %vm512_vm1, %v1216_v20, 0.0 }
 0x64f   : > { %1221 = vadd.xlane.f32.xlu2 %v1220_v21 }
 0x6ba   : > { %v1219_v22 = vpop.xlane.xlu1 %1218 }
 0x6bb   : > { %v1223_v23 = vmul.f32 %v1219_v22, %v2216_v4 }
 0x6bd   : > { %v1225_v24 = vsub.f32 %v1215_v15, %v1223_v23 }
 0x6bf   : > { %v1227_v25 = vmul.f32 %v1225_v24, %v1225_v24 }
 0x6c1   : > { %v1229_v5 = vsel %vm512_vm1, %v1227_v25, 0.0 }
 0x6c2   : > { %v1222_v26 = vpop.xlane.xlu2 %1221  ;;  %1230 = vadd.xlane.f32.xlu0 %v1229_v5 }
 0x6c3   : > { %v1224_v27 = vmul.f32 %v1222_v26, %v2216_v4 }
 0x6c5   : > { %v1226_v28 = vsub.f32 %v1216_v20, %v1224_v27 }
 0x6c7   : > { %v1228_v29 = vmul.f32 %v1226_v28, %v1226_v28 }
 0x6c9   : > { %v1232_v30 = vsel %vm512_vm1, %v1228_v29, 0.0 }
 0x6ca   : > { %1233 = vadd.xlane.f32.xlu1 %v1232_v30 }
 0x735   : > { %v1231_v31 = vpop.xlane.xlu0 %1230 }
 0x736   : > { %v1235_v32 = vmul.f32 %v1231_v31, %v2216_v4 }
 0x738   : > { %v1237_v12 = vadd.f32 1e-05, %v1235_v32 }
 0x73a   : > { %1688 = vrsqrt.f32 %v1237_v12  ;;  %vm1245_vm0 = vweird.f32 %v1237_v12 }
 0x73d   : > { %v1234_v17 = vpop.xlane.xlu1 %1233 }
 0x73e   : > { %v1236_v33 = vmul.f32 %v1234_v17, %v2216_v4 }
 0x740   : > { %v1689_v34 = vpop.eup %1688  ;;  %v1238_v35 = vadd.f32 1e-05, %v1236_v33 }
 0x741   : > { %v1240_v36 = vmul.f32 %v1689_v34, %v1237_v12  ;;  %vm1246_vm15 = vweird.f32 %v1689_v34 }
 0x742   : > { %1690 = vrsqrt.f32 %v1238_v35  ;;  %vm1247_vm2 = vmor %vm1245_vm0, %vm1246_vm15  ;;  %vm1255_vm4 = vweird.f32 %v1238_v35 }
 0x743   : > { %v1241_v37 = vmul.f32 %v1689_v34, %v1240_v36 }
 0x745   : > { %v1242_v38 = vmul.f32 0.5, %v1241_v37 }
 0x747   : > { %v1243_v39 = vsub.f32 1.5, %v1242_v38 }
 0x748   : > { %v1691_v40 = vpop.eup %1690 }
 0x749   : > { %v1244_v41 = vmul.f32 %v1689_v34, %v1243_v39  ;;  %v1250_v42 = vmul.f32 %v1691_v40, %v1238_v35  ;;  %vm1256_vm3 = vweird.f32 %v1691_v40 }
 0x74a   : > { %vm1257_vm5 = vmor %vm1255_vm4, %vm1256_vm3 }
 0x74b   : > { %v1248_v44 = vsel %vm1247_vm2, %v1689_v34, %v1244_v41  ;;  %v1251_v45 = vmul.f32 %v1691_v40, %v1250_v42 }
 0x74c   : > { %v1259_v47 = vmul.f32 %v1248_v44, %v1225_v24 }
 0x74d   : > { %v1252_v4 = vmul.f32 0.5, %v1251_v45 }
 0x74e   : > { %v1262_v48 = vmul.f32 %v1648_v43, %v1259_v47 }
 0x74f   : > { %v1253_v49 = vsub.f32 1.5, %v1252_v4 }
 0x750   : > { %v1265_v50 = vadd.f32 %v1649_v46, %v1262_v48 }
 0x751   : > { %v1254_v51 = vmul.f32 %v1691_v40, %v1253_v49 }
 0x752   : > { %1267 = vst.msk [vmem:[#allocation11] sm:$0xff] %vm512_vm1, %v1265_v50 }
 0x753   : > { %v1258_v52 = vsel %vm1257_vm5, %v1691_v40, %v1254_v51 }
 0x754   : > { %v1260_v53 = vmul.f32 %v1258_v52, %v1226_v28 }
 0x756   : > { %v1263_v54 = vmul.f32 %v1648_v43, %v1260_v53 }
 0x758   : > { %v1266_v55 = vadd.f32 %v1649_v46, %v1263_v54 }
 0x75a   : > { %1268 = vst.msk [vmem:[#allocation11 + $0x8] sm:$0xff] %vm512_vm1, %v1266_v55 }
 0x75b   : > { %1542 = dma.vmem_to_hbm [thread:$0]  (%p1566_p3), %s1278_s21, 256, %s1280_s26, [#allocation5], %s1927_s14, %s1927_s14, %s1922_s23  }
 0x75c   : > { %1877 = dma.done.wait (%p1566_p3), [#allocation5], 256  }
 0x75d   : > { %1879 = vsyncadd (%p1566_p3), [#allocation5], 4294967040 }
 0x75e PF: > { %s24_s10 = sadd.s32 1, %s1902_s10   ;;  %s2288_s27 = smov %s1886_s28 }
 0x75f   : > { %p21_p4 = scmp.ge.s32.totalorder %s24_s10, 4   ;;  %s2289_s28 = smov %s1890_s29 }
 0x760   : > { %s2290_s29 = smov %s2057_s15  ;;  %s2291_s30 = smov %s1898_s9 }
 0x761   : > { %s2292_s9 = smov %s2294_s11  ;;  %23 = sbr.rel (!%p21_p4) target bundleno = 9 (0x9), region = 121 }
 0x766   :  { %1296 = vsyncpa [#allocation4], 1 }
 0x767   :  { %1298 = vsyncpa [#allocation4 + $0x1], 1 }
 0x768   :  { %1299 = vsyncpa [#allocation7], 1 }
 0x769   :  { %1300 = vsyncpa [#allocation10], 1 }
 0x76a   :  { %1302 = vsyncpa [#allocation10 + $0x1], 1 }
 0x76b   :  { %1303 = vsyncpa [#allocation5], 1 }
 0x76c   :  { %1305 = vsyncpa [#allocation5 + $0x1], 1 }

</bundles_post_ra>
